<compile_context>
chip_gen: v6e
topology: v6e:2x2x1
jax: 0.10.0
libtpu: 0.0.40
codegen_flags: <defaults>
</compile_context>

<pallas_src>
import jax
import jax.numpy as jnp
from jax.experimental import pallas as pl
from jax.experimental.pallas import tpu as pltpu


def _round_up(n, m):
    return ((n + m - 1) // m) * m


def _mxu_dot(a, b):
    # Native bf16 MXU path when operands are bf16; accurate multi-pass f32
    # matmul (HIGHEST) when both operands are f32.  Always f32 accumulation.
    prec = (jax.lax.Precision.HIGHEST
            if (a.dtype == jnp.float32 and b.dtype == jnp.float32) else None)
    return jnp.dot(a, b, preferred_element_type=jnp.float32, precision=prec)


def regression_net_kernel(x_ref, wbig_ref, b1_ref, s_ref, b2_ref, o_ref):
    # Layer 1 (hid1) on the MXU: packed rows (tile_r, spr*nf) @ block-diag
    # (spr*nf, spr*width) -> per-sample hidden activations in 10-lane groups.
    h = _mxu_dot(x_ref[...], wbig_ref[...])
    h = h + b1_ref[...]                              # (1, spr*width) broadcast

    # sigmoid via the EUP tanh slot (no VALU divide): sigmoid(z) = 0.5*tanh(z/2)+0.5
    h = 0.5 * jnp.tanh(0.5 * h) + 0.5

    # dropout(p=0.1): identity at inference time.
    # TODO(synk): training-mode dropout (pltpu.prng_seed + prng_random_bits
    #             mask scaled by 1/(1-p)) is not emitted.

    # Layer 2 (oupt) on the MXU: (tile_r, spr*width) @ block-diag (spr*width, spr)
    # -> lane-dense (tile_r, spr) outputs; flattened row-major this is [B, 1].
    y = _mxu_dot(h, s_ref[...])
    o_ref[...] = (y + b2_ref[0, 0]).astype(o_ref.dtype)


def regression_net_forward(x, w1, b1, w2, b2, *, tile_rows=4096,
                           x_dtype=jnp.bfloat16):
    """x: [B, n_feature]; w1: [n_feature, width]; b1: [1, width];
    w2: [width, 1]; b2: [1, 1]  ->  [B, 1] (float32)."""
    B, n_feature = x.shape
    width = w1.shape[1]
    out_dtype = w1.dtype

    # Samples packed per lane-row.  For n_feature=4 -> 32 samples, packed
    # width 128 (fully lane-dense).  Falls back gracefully for other widths.
    spr = max(1, 128 // n_feature)
    packed_w = spr * n_feature
    hid_w = spr * width

    stream_dtype = jnp.dtype(x_dtype) if x_dtype is not None else x.dtype
    if x.dtype != stream_dtype:
        x = x.astype(stream_dtype)

    # Small pad (< spr rows) so [B, nf] -> [R, spr*nf] is a free row-major repack.
    b_pad = _round_up(B, spr)
    if b_pad != B:
        x = jnp.pad(x, ((0, b_pad - B), (0, 0)))
    R = b_pad // spr
    xr = x.reshape(R, packed_w)

    # Block-diagonal weights built once in the wrapper (resident in VMEM).
    eye = jnp.eye(spr, dtype=jnp.float32)
    w_big = jnp.kron(eye, w1.astype(jnp.float32)).astype(stream_dtype)   # [packed_w, hid_w]
    b1_big = jnp.tile(jnp.reshape(b1, (1, width)).astype(jnp.float32),
                      (1, spr))                                          # [1, hid_w]
    s_big = jnp.kron(eye, jnp.reshape(w2, (width, 1)).astype(jnp.float32))  # [hid_w, spr]
    b2_s = jnp.reshape(b2, (1, 1)).astype(jnp.float32)                   # SMEM scalar

    # Row tile: multiple of 8 sublanes, clamped to the (padded) packed-row count.
    tile_r = max(8, min(int(tile_rows), _round_up(R, 8)))
    tile_r = _round_up(tile_r, 8)
    grid = (pl.cdiv(R, tile_r),)   # ragged tail handled by Pallas masking

    cost = pl.CostEstimate(
        flops=int(R * (2 * packed_w * hid_w + 4 * hid_w + 2 * hid_w * spr + spr)),
        transcendentals=int(R * hid_w),
        bytes_accessed=int(R * packed_w * xr.dtype.itemsize
                           + R * spr * jnp.dtype(out_dtype).itemsize
                           + w_big.size * w_big.dtype.itemsize
                           + (b1_big.size + s_big.size + 1) * 4),
    )

    out = pl.pallas_call(
        regression_net_kernel,
        out_shape=jax.ShapeDtypeStruct((R, spr), out_dtype),
        grid=grid,
        in_specs=[
            pl.BlockSpec((tile_r, packed_w), lambda i: (i, 0)),   # streamed packed x
            pl.BlockSpec((packed_w, hid_w), lambda i: (0, 0)),    # resident block-diag W1
            pl.BlockSpec((1, hid_w), lambda i: (0, 0)),           # resident tiled b1
            pl.BlockSpec((hid_w, spr), lambda i: (0, 0)),         # resident grouped w2
            pl.BlockSpec(memory_space=pltpu.MemorySpace.SMEM),    # b2 scalar
        ],
        out_specs=pl.BlockSpec((tile_r, spr), lambda i: (i, 0)),  # lane-dense output
        compiler_params=pltpu.CompilerParams(
            dimension_semantics=("parallel",),
            vmem_limit_bytes=32 * 1024 * 1024,
        ),
        cost_estimate=cost,
    )(xr, w_big, b1_big, s_big, b2_s)

    y = out.reshape(b_pad, 1)          # row-major flatten == per-sample order
    return y[:B] if b_pad != B else y


def init_params(key, n_feature, network_width):
    """Deterministic init mimicking torch.nn.Linear defaults
    (U[-1/sqrt(fan_in), 1/sqrt(fan_in)]); weights stored pre-transposed."""
    k1, k2, k3, k4 = jax.random.split(key, 4)
    bound1 = 1.0 / jnp.sqrt(n_feature)
    bound2 = 1.0 / jnp.sqrt(network_width)
    w1 = jax.random.uniform(k1, (n_feature, network_width), jnp.float32, -bound1, bound1)
    b1 = jax.random.uniform(k2, (1, network_width), jnp.float32, -bound1, bound1)
    w2 = jax.random.uniform(k3, (network_width, 1), jnp.float32, -bound2, bound2)
    b2 = jax.random.uniform(k4, (1, 1), jnp.float32, -bound2, bound2)
    return w1, b1, w2, b2


if __name__ == "__main__":
    key = jax.random.PRNGKey(0)
    kx, kx2, kp = jax.random.split(key, 3)

    n_feature = 4
    network_width = 10
    w1, b1, w2, b2 = init_params(kp, n_feature, network_width)

    def reference(xf, w1f):
        h = jnp.dot(xf, w1f, precision=jax.lax.Precision.HIGHEST)
        h = jax.nn.sigmoid(h + b1)
        return jnp.dot(h, w2, precision=jax.lax.Precision.HIGHEST) + b2

    def bf16_round(a):
        return a.astype(jnp.bfloat16).astype(jnp.float32)

    # 1) tiny batch, f32 streaming (exact-semantics path), single grid step.
    x_small = jax.random.normal(kx, (8, n_feature), dtype=jnp.float32)
    out_small = jax.block_until_ready(
        regression_net_forward(x_small, w1, b1, w2, b2, x_dtype=jnp.float32))
    assert out_small.shape == (8, 1)
    assert jnp.allclose(out_small, reference(x_small, w1), atol=2e-3, rtol=2e-3)

    # 2) ragged multi-step grid: 300 samples -> 10 packed rows, tile_rows=8 ->
    #    grid=(2,) with a masked tail block.  f32 streaming.
    x_big = jax.random.normal(kx2, (300, n_feature), dtype=jnp.float32)
    out_big = jax.block_until_ready(
        regression_net_forward(x_big, w1, b1, w2, b2, tile_rows=8,
                               x_dtype=jnp.float32))
    assert out_big.shape == (300, 1)
    assert jnp.allclose(out_big, reference(x_big, w1), atol=2e-3, rtol=2e-3)

    # 3) default path: bf16-streamed x with bf16 layer-1 weights (halves the
    #    dominant HBM stream); compare against a reference that sees the same
    #    bf16-rounded x and W1.
    out_bf16 = jax.block_until_ready(regression_net_forward(x_big, w1, b1, w2, b2))
    ref_bf16 = reference(bf16_round(x_big), bf16_round(w1))
    assert out_bf16.shape == (300, 1)
    assert jnp.allclose(out_bf16, ref_bf16, atol=2e-3, rtol=2e-3)

    print("KERNEL_OK")
</pallas_src>

<mosaic_0001>
module attributes {stable_mosaic.version = 11 : i64} {
  func.func @regression_net_kernel(%arg0: i32, %arg1: memref<8x128xf32, #tpu.memory_space<vmem>>, %arg2: memref<128x320xf32, #tpu.memory_space<vmem>>, %arg3: memref<1x320xf32, #tpu.memory_space<vmem>>, %arg4: memref<320x32xf32, #tpu.memory_space<vmem>>, %arg5: memref<1x1xf32, #tpu.memory_space<smem>>, %arg6: memref<8x32xf32, #tpu.memory_space<vmem>>) attributes {dimension_semantics = [#tpu.dimension_semantics<parallel>], iteration_bounds = array<i64: 1>, scalar_prefetch = 0 : i64, scratch_operands = 0 : i64, tpu.core_type = #tpu.core_type<tc>, window_params = [{transform_indices = @transform_0, window_bounds = array<i64: 8, 128>}, {pipeline_mode = #tpu.pipeline_mode<synchronous>, transform_indices = @transform_1, window_bounds = array<i64: 128, 320>}, {pipeline_mode = #tpu.pipeline_mode<synchronous>, transform_indices = @transform_2, window_bounds = array<i64: 1, 320>}, {pipeline_mode = #tpu.pipeline_mode<synchronous>, transform_indices = @transform_3, window_bounds = array<i64: 320, 32>}, {transform_indices = @transform_4, window_bounds = array<i64: 1, 1>}, {transform_indices = @transform_5, window_bounds = array<i64: 8, 32>}]} {
    %c0 = arith.constant 0 : index
    %c0_0 = arith.constant 0 : index
    %0 = vector.load %arg1[%c0, %c0_0] : memref<8x128xf32, #tpu.memory_space<vmem>>, vector<8x128xf32>
    %c0_1 = arith.constant 0 : index
    %c0_2 = arith.constant 0 : index
    %1 = vector.load %arg2[%c0_1, %c0_2] : memref<128x320xf32, #tpu.memory_space<vmem>>, vector<128x320xf32>
    %cst = arith.constant dense<0.000000e+00> : vector<8x320xf32>
    %2 = tpu.matmul %0, %1, %cst {dimension_numbers = #tpu.dot_dimension_numbers<[1], [0], [0], [1], [0, 0, 1, 1], [], []>, precision = #tpu.contract_precision<fp32>} : vector<8x128xf32>, vector<128x320xf32>, vector<8x320xf32> -> vector<8x320xf32>
    %c0_3 = arith.constant 0 : index
    %c0_4 = arith.constant 0 : index
    %3 = vector.load %arg3[%c0_3, %c0_4] : memref<1x320xf32, #tpu.memory_space<vmem>>, vector<1x320xf32>
    %4 = vector.broadcast %3 : vector<1x320xf32> to vector<8x320xf32>
    %5 = arith.addf %2, %4 : vector<8x320xf32>
    %cst_5 = arith.constant 5.000000e-01 : f32
    %6 = vector.broadcast %cst_5 : f32 to vector<8x320xf32>
    %7 = arith.mulf %6, %5 : vector<8x320xf32>
    %8 = math.tanh %7 : vector<8x320xf32>
    %cst_6 = arith.constant 5.000000e-01 : f32
    %9 = vector.broadcast %cst_6 : f32 to vector<8x320xf32>
    %10 = arith.mulf %9, %8 : vector<8x320xf32>
    %cst_7 = arith.constant 5.000000e-01 : f32
    %11 = vector.broadcast %cst_7 : f32 to vector<8x320xf32>
    %12 = arith.addf %10, %11 : vector<8x320xf32>
    %c0_8 = arith.constant 0 : index
    %c0_9 = arith.constant 0 : index
    %13 = vector.load %arg4[%c0_8, %c0_9] : memref<320x32xf32, #tpu.memory_space<vmem>>, vector<320x32xf32>
    %cst_10 = arith.constant dense<0.000000e+00> : vector<8x32xf32>
    %14 = tpu.matmul %12, %13, %cst_10 {dimension_numbers = #tpu.dot_dimension_numbers<[1], [0], [0], [1], [0, 0, 1, 1], [], []>, precision = #tpu.contract_precision<fp32>} : vector<8x320xf32>, vector<320x32xf32>, vector<8x32xf32> -> vector<8x32xf32>
    %c0_11 = arith.constant 0 : index
    %c0_12 = arith.constant 0 : index
    %15 = memref.load %arg5[%c0_11, %c0_12] : memref<1x1xf32, #tpu.memory_space<smem>>
    %16 = vector.broadcast %15 : f32 to vector<8x32xf32>
    %17 = arith.addf %14, %16 : vector<8x32xf32>
    %c0_13 = arith.constant 0 : index
    %c0_14 = arith.constant 0 : index
    %18 = vector.load %arg6[%c0_13, %c0_14] : memref<8x32xf32, #tpu.memory_space<vmem>>, vector<8x32xf32>
    tpu.vector_store %arg6[%c0_13, %c0_14], %17 {strides = array<i32>} : memref<8x32xf32, #tpu.memory_space<vmem>>, vector<8x32xf32>,
    return
  }
  func.func @transform_0(%arg0: i32) -> (i32, i32) {
    %c0_i32 = arith.constant 0 : i32
    %c0_i32_0 = arith.constant 0 : i32
    return %arg0, %c0_i32 : i32, i32
  }
  func.func @transform_1(%arg0: i32) -> (i32, i32) {
    %c0_i32 = arith.constant 0 : i32
    %c0_i32_0 = arith.constant 0 : i32
    %c0_i32_1 = arith.constant 0 : i32
    return %c0_i32, %c0_i32_0 : i32, i32
  }
  func.func @transform_2(%arg0: i32) -> (i32, i32) {
    %c0_i32 = arith.constant 0 : i32
    %c0_i32_0 = arith.constant 0 : i32
    %c0_i32_1 = arith.constant 0 : i32
    return %c0_i32, %c0_i32_0 : i32, i32
  }
  func.func @transform_3(%arg0: i32) -> (i32, i32) {
    %c0_i32 = arith.constant 0 : i32
    %c0_i32_0 = arith.constant 0 : i32
    %c0_i32_1 = arith.constant 0 : i32
    return %c0_i32, %c0_i32_0 : i32, i32
  }
  func.func @transform_4(%arg0: i32) -> (i32, i32) {
    %c0_i32 = arith.constant 0 : i32
    %c0_i32_0 = arith.constant 0 : i32
    %c0_i32_1 = arith.constant 0 : i32
    return %c0_i32, %c0_i32_0 : i32, i32
  }
  func.func @transform_5(%arg0: i32) -> (i32, i32) {
    %c0_i32 = arith.constant 0 : i32
    %c0_i32_0 = arith.constant 0 : i32
    return %arg0, %c0_i32 : i32, i32
  }
}

</mosaic_0001>

<bundles_post_ra>
// kernel: tpu_custom_call.1
= control target key start
LH: loop header
LB: loop body
LE: loop exit
PB: predicated region body
PF: predicated region fallthrough
CT: control target
= control target key end

     0   :  { %11 = vsyncpa [#allocation4], 0  ;;  %v5821_v7 = vmov 0.0   ;;  %vm3783_vm0 = vmmov 0   ;;  %vm1638_vm1 = vcmask 523264   ;;  %vm3041_vm2 = vcmask 261120   ;;  %s5800_s0 = inlined_call_operand.vmem [shape: f32[1,128], index: 0, kind: input, shape index: {}]   ;;  %s5801_s1 = inlined_call_operand.vmem [shape: f32[128,320], index: 1, kind: input, shape index: {}]   ;;  %s5802_s2 = inlined_call_operand.vmem [shape: f32[1,320], index: 2, kind: input, shape index: {}]   ;;  %s5803_s3 = inlined_call_operand.vmem [shape: f32[320,32], index: 3, kind: input, shape index: {}]   ;;  %s5804_s4 = inlined_call_operand.<no memory space> [shape: f32[1,1], index: 4, kind: input, shape index: {}]   ;;  %s5805_s5 = inlined_call_operand.hbm [shape: f32[1,32], index: 5, kind: output, shape index: {}]  }
   0x1   :  { %v69_v0 = vld [vmem:[%s5801_s1 + $0x170] sm:$0xff]  ;;  %v68_v1 = vld [vmem:[%s5801_s1 + $0x168] sm:$0xff]  ;;  %v66_v4 = vld [vmem:[%s5801_s1 + $0x158] sm:$0xff]  ;;  %184 = vmatprep.mubr.f32.mxu0 %v5821_v7  ;;  %420 = vmatprep.mubr.f32.mxu1 %v5821_v7 }
   0x2   :  { %v3823_v2 = vand.u32 4294901760, %v69_v0  ;;  %v3825_v3 = vand.u32 4294901760, %v68_v1  ;;  %v65_v5 = vld [vmem:[%s5801_s1 + $0x150] sm:$0xff]  ;;  %v63_v6 = vld [vmem:[%s5801_s1 + $0x140] sm:$0xff]  ;;  %v3838_v8 = vand.u32 4294901760, %v66_v4  ;;  %v62_v11 = vld [vmem:[%s5801_s1 + $0x138] sm:$0xff] }
   0x3   :  { %v3840_v9 = vand.u32 4294901760, %v65_v5  ;;  %v3842_v10 = vand.u32 4294901760, %v63_v6  ;;  %v60_v12 = vld [vmem:[%s5801_s1 + $0x128] sm:$0xff]  ;;  %v59_v13 = vld [vmem:[%s5801_s1 + $0x120] sm:$0xff]  ;;  %v3854_v14 = vand.u32 4294901760, %v62_v11  ;;  %v57_v17 = vld [vmem:[%s5801_s1 + $0x110] sm:$0xff] }
   0x4   :  { %89 = vmatprep.subr.mxu0 %v3823_v2  ;;  %v3856_v15 = vand.u32 4294901760, %v60_v12  ;;  %v3858_v16 = vand.u32 4294901760, %v59_v13  ;;  %v3864_v18 = vsub.f32 %v69_v0, %v3823_v2  ;;  %v3869_v19 = vld [vmem:[%s5801_s1 + $0x108] sm:$0xff]  ;;  %v3874_v20 = vld [vmem:[%s5801_s1 + $0xf8] sm:$0xff]  ;;  %v3877_v21 = vand.u32 4294901760, %v57_v17  ;;  %v3891_v25 = vld [vmem:[%s5801_s1 + $0xf0] sm:$0xff] }
   0x5   :  { %91 = vmatpush1.msra.mxu0 %v3825_v3  ;;  %v3880_v22 = vand.u32 4294901760, %v3869_v19  ;;  %v3883_v23 = vsub.f32 %v68_v1, %v3825_v3  ;;  %v3886_v24 = vand.u32 4294901760, %v3874_v20  ;;  %v3896_v26 = vld [vmem:[%s5801_s1 + $0xe0] sm:$0xff]  ;;  %v3901_v27 = vld [vmem:[%s5801_s1 + $0xd8] sm:$0xff]  ;;  %v3906_v29 = vsub.f32 %v66_v4, %v3838_v8  ;;  %v3917_v32 = vld [vmem:[%s5801_s1 + $0xc8] sm:$0xff] }
   0x6   :  { %5945 = vst [vmem:[#allocation6_spill] sm:$0xff] %v3864_v18  ;;  %93 = vmatprep.subr.mxu0 %v3838_v8  ;;  %v5818_v28 = vand.u32 4294901760, %v3864_v18  ;;  %v3909_v30 = vand.u32 4294901760, %v3891_v25  ;;  %v3912_v31 = vsub.f32 %v65_v5, %v3840_v9  ;;  %v3922_v34 = vand.u32 4294901760, %v3896_v26  ;;  %v3942_v41 = vld [vmem:[%s5801_s1 + $0xc0] sm:$0xff]  ;;  %v3966_v50 = vld [vmem:[%s5801_s1 + $0xb0] sm:$0xff] }
   0x7   :  { %95 = vmatpush1.msra.mxu0 %v3840_v9  ;;  %v5817_v33 = vand.u32 4294901760, %v3883_v23  ;;  %v3925_v35 = vsub.f32 %v63_v6, %v3842_v10  ;;  %v3928_v36 = vand.u32 4294901760, %v3901_v27  ;;  %v5816_v38 = vand.u32 4294901760, %v3906_v29  ;;  %v3979_v55 = vld [vmem:[%s5801_s1 + $0xa8] sm:$0xff]  ;;  %v3991_v60 = vld [vmem:[%s5801_s1 + $0x98] sm:$0xff]  ;;  %v4006_v1 = vld [vmem:[%s5801_s1 + $0x90] sm:$0xff] }
   0x8   :  { %5946 = vst [vmem:[#allocation7_spill] sm:$0xff] %v3922_v34  ;;  %97 = vmatprep.subr.mxu0 %v3842_v10  ;;  %v199_v37 = vsub.f32 %v3864_v18, %v5818_v28  ;;  %v5814_v39 = vand.u32 4294901760, %v3912_v31  ;;  %v3937_v40 = vsub.f32 %v62_v11, %v3854_v14  ;;  %v3950_v44 = vand.u32 4294901760, %v3917_v32 }
   0x9   :  { %5947 = vst [vmem:[#allocation8_spill] sm:$0xff] %v3928_v36  ;;  %99 = vmatpush1.msra.mxu0 %v3854_v14  ;;  %v205_v42 = vsub.f32 %v3883_v23, %v5817_v33  ;;  %v5813_v43 = vand.u32 4294901760, %v3925_v35  ;;  %v3953_v45 = vsub.f32 %v60_v12, %v3856_v15  ;;  %v211_v47 = vsub.f32 %v3906_v29, %v5816_v38  ;;  %v4020_v12 = vld [vmem:[%s5801_s1 + $0x80] sm:$0xff]  ;;  %v4133_v38 = vld [vmem:[%s5801_s1 + $0x30] sm:$0xff] }
   0xa   :  { %5948 = vst [vmem:[#allocation9_spill] sm:$0xff] %v3950_v44  ;;  %101 = vmatprep.subr.mxu0 %v3856_v15  ;;  %v200_v46 = vand.u32 4294901760, %v199_v37  ;;  %v217_v48 = vsub.f32 %v3912_v31, %v5814_v39  ;;  %v5811_v49 = vand.u32 4294901760, %v3937_v40  ;;  %v3974_v54 = vand.u32 4294901760, %v3942_v41 }
   0xb   :  { %103 = vmatpush1.msra.mxu0 %v3858_v16  ;;  %v206_v51 = vand.u32 4294901760, %v205_v42  ;;  %v223_v52 = vsub.f32 %v3925_v35, %v5813_v43  ;;  %v5809_v53 = vand.u32 4294901760, %v3953_v45  ;;  %v212_v56 = vand.u32 4294901760, %v211_v47 }
   0xc   :  { %5949 = vst [vmem:[#allocation10_spill] sm:$0xff] %v3974_v54  ;;  %105 = vmatprep.subr.mxu0 %v3877_v21  ;;  %201 = vmatprep.subr.mxu1 %v200_v46  ;;  %v218_v57 = vand.u32 4294901760, %v217_v48  ;;  %v229_v58 = vsub.f32 %v3937_v40, %v5811_v49  ;;  %v3986_v59 = vsub.f32 %v59_v13, %v3858_v16  ;;  %v3998_v63 = vand.u32 4294901760, %v3966_v50  ;;  %v4106_v49 = vld [vmem:[%s5801_s1 + $0x48] sm:$0xff] }
   0xd   :  { %107 = vmatpush1.msra.mxu0 %v3880_v22  ;;  %207 = vmatpush1.msra.mxu1 %v206_v51  ;;  %v224_v61 = vand.u32 4294901760, %v223_v52  ;;  %v235_v62 = vsub.f32 %v3953_v45, %v5809_v53  ;;  %v4001_v0 = vsub.f32 %v57_v17, %v3877_v21  ;;  %v4011_v6 = vand.u32 4294901760, %v3979_v55 }
   0xe   :  { %5950 = vst [vmem:[#allocation11_spill] sm:$0xff] %v3998_v63  ;;  %109 = vmatprep.subr.mxu0 %v3886_v24  ;;  %213 = vmatprep.subr.mxu1 %v212_v56  ;;  %v230_v4 = vand.u32 4294901760, %v229_v58  ;;  %v5808_v5 = vand.u32 4294901760, %v3986_v59  ;;  %v4015_v11 = vsub.f32 %v3869_v19, %v3880_v22  ;;  %v4025_v37 = vand.u32 4294901760, %v3991_v60  ;;  %v4034_v19 = vld [vmem:[%s5801_s1 + $0x78] sm:$0xff] }
   0xf   :  { %5951 = vst [vmem:[#allocation12_spill] sm:$0xff] %v4011_v6  ;;  %111 = vmatpush1.msra.mxu0 %v3909_v30  ;;  %219 = vmatpush1.msra.mxu1 %v218_v57  ;;  %v236_v13 = vand.u32 4294901760, %v235_v62  ;;  %v5806_v17 = vand.u32 4294901760, %v4001_v0  ;;  %v4029_v42 = vsub.f32 %v3874_v20, %v3886_v24  ;;  %v4042_v48 = vand.u32 4294901760, %v4006_v1 }
  0x10   :  { %5952 = vst [vmem:[#allocation13_spill] sm:$0xff] %v4025_v37  ;;  %113 = vmatprep.subr.mxu0 %v3922_v34  ;;  %225 = vmatprep.subr.mxu1 %v224_v61  ;;  %v241_v46 = vsub.f32 %v3986_v59, %v5808_v5  ;;  %v5807_v47 = vand.u32 4294901760, %v4015_v11  ;;  %v4046_v20 = vsub.f32 %v3891_v25, %v3909_v30  ;;  %v4054_v56 = vand.u32 4294901760, %v4020_v12  ;;  %v4063_v25 = vld [vmem:[%s5801_s1 + $0x68] sm:$0xff]  ;;  %v4090_v5 = vld [vmem:[%s5801_s1 + $0x50] sm:$0xff] }
  0x11   :  { %5953 = vst [vmem:[#allocation14_spill] sm:$0xff] %v4042_v48  ;;  %115 = vmatpush1.msra.mxu0 %v3928_v36  ;;  %231 = vmatpush1.msra.mxu1 %v230_v4  ;;  %v247_v51 = vsub.f32 %v4001_v0, %v5806_v17  ;;  %v5810_v52 = vand.u32 4294901760, %v4029_v42  ;;  %v4058_v57 = vsub.f32 %v3896_v26, %v3922_v34  ;;  %v4071_v4 = vand.u32 4294901760, %v4034_v19  ;;  %v4076_v26 = vld [vmem:[%s5801_s1 + $0x60] sm:$0xff] }
  0x12   :  { %5954 = vst [vmem:[#allocation15_spill] sm:$0xff] %v4054_v56  ;;  %117 = vmatprep.subr.mxu0 %v3950_v44  ;;  %237 = vmatprep.subr.mxu1 %v236_v13  ;;  %v242_v58 = vand.u32 4294901760, %v241_v46  ;;  %v253_v61 = vsub.f32 %v4015_v11, %v5807_v47  ;;  %v5812_v62 = vand.u32 4294901760, %v4046_v20  ;;  %v4085_v47 = vsub.f32 %v3901_v27, %v3928_v36 }
  0x13   :  { %5955 = vst [vmem:[#allocation16_spill] sm:$0xff] %v4071_v4  ;;  %119 = vmatpush1.msra.mxu0 %v3974_v54  ;;  %v248_v17 = vand.u32 4294901760, %v247_v51  ;;  %v259_v13 = vsub.f32 %v4029_v42, %v5810_v52  ;;  %v5815_v46 = vand.u32 4294901760, %v4058_v57  ;;  %v4097_v52 = vand.u32 4294901760, %v4063_v25 }
  0x14   :  { %243 = vmatpush1.msra.mxu1 %v242_v58  ;;  %121 = vmatprep.subr.mxu0 %v3998_v63  ;;  %v254_v53 = vand.u32 4294901760, %v253_v61  ;;  %v265_v51 = vsub.f32 %v4046_v20, %v5812_v62  ;;  %v4101_v27 = vsub.f32 %v3917_v32, %v3950_v44  ;;  %v5819_v62 = vand.u32 4294901760, %v4085_v47  ;;  %v4119_v32 = vld [vmem:[%s5801_s1 + $0x38] sm:$0xff] }
  0x15   :  { %5956 = vst [vmem:[#allocation17_spill] sm:$0xff] %v4097_v52  ;;  %249 = vmatprep.subr.mxu1 %v248_v17  ;;  %123 = vmatpush1.msra.mxu0 %v4011_v6  ;;  %v260_v58 = vand.u32 4294901760, %v259_v13  ;;  %v271_v61 = vsub.f32 %v4058_v57, %v5815_v46  ;;  %v4114_v43 = vand.u32 4294901760, %v4076_v26  ;;  %v4125_v39 = vsub.f32 %v3942_v41, %v3974_v54 }
  0x16   :  { %255 = vmatpush1.msra.mxu1 %v254_v53  ;;  %125 = vmatprep.subr.mxu0 %v4025_v37  ;;  %v266_v17 = vand.u32 4294901760, %v265_v51  ;;  %v5820_v13 = vand.u32 4294901760, %v4101_v27  ;;  %v4128_v46 = vand.u32 4294901760, %v4090_v5  ;;  %v277_v51 = vsub.f32 %v4085_v47, %v5819_v62 }
  0x17   :  { %5957 = vst [vmem:[#allocation18_spill] sm:$0xff] %v4114_v43  ;;  %261 = vmatprep.subr.mxu1 %v260_v58  ;;  %127 = vmatpush1.msra.mxu0 %v4042_v48  ;;  %v272_v53 = vand.u32 4294901760, %v271_v61  ;;  %v4141_v41 = vsub.f32 %v3966_v50, %v3998_v63  ;;  %v4144_v33 = vand.u32 4294901760, %v4106_v49  ;;  %v4153_v28 = vsub.f32 %v3979_v55, %v4011_v6  ;;  %v4161_v50 = vld [vmem:[%s5801_s1 + $0x20] sm:$0xff]  ;;  %v4175_v61 = vld [vmem:[%s5801_s1 + $0x18] sm:$0xff] }
  0x18   :  { %5958 = vst [vmem:[#allocation19_spill] sm:$0xff] %v4128_v46  ;;  %267 = vmatpush1.msra.mxu1 %v266_v17  ;;  %129 = vmatprep.subr.mxu0 %v4054_v56  ;;  %v283_v58 = vsub.f32 %v4101_v27, %v5820_v13  ;;  %v4156_v62 = vand.u32 4294901760, %v4119_v32  ;;  %v278_v17 = vand.u32 4294901760, %v277_v51  ;;  %v4167_v7 = vsub.f32 %v3991_v60, %v4025_v37 }
  0x19   :  { %5959 = vst [vmem:[#allocation20_spill] sm:$0xff] %v4144_v33  ;;  %273 = vmatprep.subr.mxu1 %v272_v53  ;;  %131 = vmatpush1.msra.mxu0 %v4071_v4  ;;  %v4170_v55 = vand.u32 4294901760, %v4133_v38  ;;  %v5962_v6 = vand.u32 4294901760, %v4125_v39  ;;  %v5837_v13 = vand.u32 4294901760, %v4153_v28  ;;  %v4184_v60 = vsub.f32 %v4006_v1, %v4042_v48  ;;  %v4201_v1 = vld [vmem:[%s5801_s1 + $0x8] sm:$0xff] }
  0x1a   :  { %5960 = vst [vmem:[#allocation21_spill] sm:$0xff] %v4156_v62  ;;  %133 = vmatprep.subr.mxu0 %v4097_v52  ;;  %v284_v53 = vand.u32 4294901760, %v283_v58  ;;  %279 = vmatpush1.msra.mxu1 %v278_v17  ;;  %v5963_v37 = vand.u32 4294901760, %v4141_v41  ;;  %v4192_v58 = vand.u32 4294901760, %v4161_v50  ;;  %v4209_v48 = vand.u32 4294901760, %v4175_v61 }
  0x1b   :  { %5961 = vst [vmem:[#allocation22_spill] sm:$0xff] %v4170_v55  ;;  %v289_v51 = vsub.f32 %v4125_v39, %v5962_v6  ;;  %135 = vmatpush1.msra.mxu0 %v4114_v43  ;;  %v4196_v6 = vsub.f32 %v4020_v12, %v4054_v56  ;;  %v4214_v12 = vld [vmem:[%s5801_s1] sm:$0xff]  ;;  %v5965_v36 = vand.u32 4294901760, %v4184_v60  ;;  %v4230_v34 = vand.u32 4294901760, %v4201_v1 }
  0x1c   :  { %v295_v63 = vsub.f32 %v4141_v41, %v5963_v37  ;;  %285 = vmatprep.subr.mxu1 %v284_v53  ;;  %137 = vmatprep.subr.mxu0 %v4128_v46  ;;  %v301_v37 = vsub.f32 %v4153_v28, %v5837_v13  ;;  %v5964_v53 = vand.u32 4294901760, %v4167_v7  ;;  %v4223_v13 = vsub.f32 %v4034_v19, %v4071_v4  ;;  %v22_v19 = vld [vmem:[%s5800_s0] sm:$0xff] }
  0x1d   :  { %v290_v17 = vand.u32 4294901760, %v289_v51  ;;  %139 = vmatpush1.msra.mxu0 %v4144_v33  ;;  %v5846_v44 = vand.u32 4294901760, %v4196_v6  ;;  %v4245_v4 = vand.u32 4294901760, %v4214_v12 }
  0x1e   :  { %v296_v56 = vand.u32 4294901760, %v295_v63  ;;  %v307_v51 = vsub.f32 %v4167_v7, %v5964_v53  ;;  %v302_v54 = vand.u32 4294901760, %v301_v37  ;;  %141 = vmatprep.subr.mxu0 %v4156_v62  ;;  %v313_v63 = vsub.f32 %v4184_v60, %v5965_v36 }
  0x1f   :  { %291 = vmatpush1.msra.mxu1 %v290_v17  ;;  %v4234_v53 = vsub.f32 %v4063_v25, %v4097_v52  ;;  %143 = vmatpush1.msra.mxu0 %v4170_v55  ;;  %v319_v37 = vsub.f32 %v4196_v6, %v5846_v44  ;;  %v5847_v36 = vand.u32 4294901760, %v4223_v13  ;;  %v4265_v52 = vsub.f32 %v4106_v49, %v4144_v33 }
  0x20   :  { %297 = vmatprep.subr.mxu1 %v296_v56  ;;  %v308_v17 = vand.u32 4294901760, %v307_v51  ;;  %v314_v25 = vand.u32 4294901760, %v313_v63  ;;  %145 = vmatprep.subr.mxu0 %v4192_v58  ;;  %v4251_v56 = vsub.f32 %v4076_v26, %v4114_v43  ;;  %v4255_v51 = vsub.f32 %v4090_v5, %v4128_v46 }
  0x21   :  { %303 = vmatpush1.msra.mxu1 %v302_v54  ;;  %v320_v44 = vand.u32 4294901760, %v319_v37  ;;  %147 = vmatpush1.msra.mxu0 %v4209_v48  ;;  %v325_v54 = vsub.f32 %v4223_v13, %v5847_v36  ;;  %v4261_v63 = vand.u32 4294901760, %v22_v19  ;;  %v5967_v5 = vand.u32 4294901760, %v4234_v53 }
  0x22   :  { %309 = vmatprep.subr.mxu1 %v308_v17  ;;  %149 = vmatprep.subr.mxu0 %v4230_v34  ;;  %v4275_v36 = vsub.f32 %v4119_v32, %v4156_v62  ;;  %v5968_v37 = vand.u32 4294901760, %v4251_v56  ;;  %v5969_v32 = vand.u32 4294901760, %v4255_v51  ;;  %v4310_v62 = vsub.f32 %v4175_v61, %v4209_v48 }
  0x23   :  { %5966 = vst [vmem:[#allocation23_spill] sm:$0xff] %v4261_v63  ;;  %315 = vmatpush1.msra.mxu1 %v314_v25  ;;  %v331_v26 = vsub.f32 %v4234_v53, %v5967_v5  ;;  %v326_v46 = vand.u32 4294901760, %v325_v54  ;;  %151 = vmatpush1.msra.mxu0 %v4245_v4  ;;  %v4279_v49 = vsub.f32 %v22_v19, %v4261_v63  ;;  %v5856_v25 = vand.u32 4294901760, %v4265_v52 }
  0x24   :  { %321 = vmatprep.subr.mxu1 %v320_v44  ;;  %v4284_v5 = vsub.f32 %v4133_v38, %v4170_v55  ;;  %v337_v33 = vsub.f32 %v4251_v56, %v5968_v37  ;;  %v343_v44 = vsub.f32 %v4255_v51, %v5969_v32  ;;  %430 = vmatprep.subr.mxu0 %v3864_v18  ;;  %v5858_v19 = vand.u32 4294901760, %v4275_v36 }
  0x25   :  { %v332_v17 = vand.u32 4294901760, %v331_v26  ;;  %327 = vmatpush1.msra.mxu1 %v326_v46  ;;  %v4295_v54 = vand.u32 4294901760, %v4279_v49  ;;  %v349_v38 = vsub.f32 %v4265_v52, %v5856_v25  ;;  %v4303_v37 = vsub.f32 %v4161_v50, %v4192_v58  ;;  %5971 = vst [vmem:[#allocation25_spill] sm:$0xff] %v4310_v62 }
  0x26   :  { %v5861_v26 = vand.u32 4294901760, %v4284_v5  ;;  %v338_v32 = vand.u32 4294901760, %v337_v33  ;;  %v344_v55 = vand.u32 4294901760, %v343_v44  ;;  %v355_v46 = vsub.f32 %v4275_v36, %v5858_v19 }
  0x27   :  { %5970 = vst [vmem:[#allocation24_spill] sm:$0xff] %v4295_v54  ;;  %333 = vmatprep.subr.mxu1 %v332_v17  ;;  %v188_v25 = vsub.f32 %v4279_v49, %v4295_v54  ;;  %v350_v18 = vand.u32 4294901760, %v349_v38  ;;  %v5865_v17 = vand.u32 4294901760, %v4303_v37  ;;  %v5864_v44 = vand.u32 4294901760, %v4310_v62 }
  0x28   :  { %v361_v50 = vsub.f32 %v4284_v5, %v5861_v26  ;;  %339 = vmatpush1.msra.mxu1 %v338_v32  ;;  %v356_v33 = vand.u32 4294901760, %v355_v46  ;;  %v4321_v19 = vsub.f32 %v4201_v1, %v4230_v34  ;;  %v4325_v61 = vsub.f32 %v4214_v12, %v4245_v4 }
  0x29   :  { %345 = vmatprep.subr.mxu1 %v344_v55  ;;  %v4327_v38 = vand.u32 4294901760, %v188_v25  ;;  %v367_v26 = vsub.f32 %v4303_v37, %v5865_v17  ;;  %v373_v32 = vsub.f32 %v4310_v62, %v5864_v44  ;;  %v5985_v44 = vld [vmem:[#allocation17_spill] sm:$0xff]  ;;  %v5986_v17 = vld [vmem:[#allocation19_spill] sm:$0xff] }
  0x2a   :  { %5972 = vst [vmem:[#allocation26_spill] sm:$0xff] %v4325_v61  ;;  %v362_v54 = vand.u32 4294901760, %v361_v50  ;;  %351 = vmatpush1.msra.mxu1 %v350_v18  ;;  %v5863_v1 = vand.u32 4294901760, %v4321_v19  ;;  %v5862_v46 = vand.u32 4294901760, %v4325_v61 }
  0x2b   :  { %5973 = vst [vmem:[#allocation27_spill] sm:$0xff] %v4327_v38  ;;  %190 = vmatmul.mubr.f32.vlgmr.msra.gmra.mxu0 %v4327_v38  ;;  %357 = vmatprep.subr.mxu1 %v356_v33  ;;  %v368_v55 = vand.u32 4294901760, %v367_v26  ;;  %v374_v12 = vand.u32 4294901760, %v373_v32  ;;  %v5975_v33 = vld [vmem:[#allocation7_spill] sm:$0xff]  ;;  %v5976_v32 = vld [vmem:[#allocation8_spill] sm:$0xff]  ;;  %v5987_v38 = vld [vmem:[#allocation6_spill] sm:$0xff] }
  0x2c   :  { %433 = vmatpush1.msra.mxu0 %v3883_v23  ;;  %363 = vmatpush1.msra.mxu1 %v362_v54  ;;  %v379_v18 = vsub.f32 %v4321_v19, %v5863_v1  ;;  %v385_v25 = vsub.f32 %v4325_v61, %v5862_v46  ;;  %v5974_v54 = vmov 0.0   ;;  %v5983_v46 = vld [vmem:[#allocation15_spill] sm:$0xff]  ;;  %v5984_v1 = vld [vmem:[#allocation16_spill] sm:$0xff] }
  0x2d   :  { %436 = vmatprep.subr.mxu0 %v3906_v29  ;;  %369 = vmatprep.subr.mxu1 %v368_v55  ;;  %v5977_v55 = vld [vmem:[#allocation9_spill] sm:$0xff] }
  0x2e   :  { %439 = vmatpush1.msra.mxu0 %v3912_v31  ;;  %375 = vmatpush1.msra.mxu1 %v374_v12  ;;  %v380_v50 = vand.u32 4294901760, %v379_v18  ;;  %v386_v26 = vand.u32 4294901760, %v385_v25  ;;  %v5978_v12 = vld [vmem:[#allocation10_spill] sm:$0xff]  ;;  %v5979_v18 = vld [vmem:[#allocation11_spill] sm:$0xff]  ;;  %v5980_v25 = vld [vmem:[#allocation12_spill] sm:$0xff] }
  0x2f   :  { %442 = vmatprep.subr.mxu0 %v3925_v35  ;;  %556 = vmatprep.mubr.f32.mxu0 %v5974_v54 }
  0x30   :  { %445 = vmatpush1.msra.mxu0 %v3937_v40  ;;  %381 = vmatprep.subr.mxu1 %v380_v50  ;;  %v5981_v50 = vld [vmem:[#allocation13_spill] sm:$0xff] }
  0x31   :  { %448 = vmatprep.subr.mxu0 %v3953_v45  ;;  %387 = vmatpush1.msra.mxu1 %v386_v26  ;;  %v5982_v26 = vld [vmem:[#allocation14_spill] sm:$0xff] }
  0x32   :  { %451 = vmatpush1.msra.mxu0 %v3986_v59  ;;  %422 = vmatmul.mubr.f32.vlgmr.msra.gmra.mxu1 %v4261_v63  ;;  %v5988_v63 = vand.u32 4294901760, %v5987_v38  ;;  %v5995_v38 = vand.u32 4294901760, %v3925_v35  ;;  %v6000_v35 = vand.u32 4294901760, %v4001_v0 }
  0x33   :  { %454 = vmatprep.subr.mxu0 %v4001_v0  ;;  %566 = vmatprep.subr.mxu1 %v3823_v2  ;;  %v6004_v0 = vand.u32 4294901760, %v4058_v57 }
  0x34   :  { %457 = vmatpush1.msra.mxu0 %v4015_v11  ;;  %568 = vmatpush1.msra.mxu1 %v3825_v3 }
  0x35   :  { %460 = vmatprep.subr.mxu0 %v4029_v42  ;;  %570 = vmatprep.subr.mxu1 %v3838_v8 }
  0x36   :  { %463 = vmatpush1.msra.mxu0 %v4046_v20  ;;  %572 = vmatpush1.msra.mxu1 %v3840_v9 }
  0x37   :  { %466 = vmatprep.subr.mxu0 %v4058_v57  ;;  %574 = vmatprep.subr.mxu1 %v3842_v10  ;;  %v6019_v57 = vand.u32 4294901760, %v4284_v5 }
  0x38   :  { %469 = vmatpush1.msra.mxu0 %v4085_v47  ;;  %576 = vmatpush1.msra.mxu1 %v3854_v14 }
  0x39   :  { %472 = vmatprep.subr.mxu0 %v4101_v27  ;;  %578 = vmatprep.subr.mxu1 %v3856_v15 }
  0x3a   :  { %475 = vmatpush1.msra.mxu0 %v4125_v39  ;;  %580 = vmatpush1.msra.mxu1 %v3858_v16 }
  0x3b   :  { %478 = vmatprep.subr.mxu0 %v4141_v41  ;;  %582 = vmatprep.subr.mxu1 %v3877_v21 }
  0x3c   :  { %481 = vmatpush1.msra.mxu0 %v4153_v28  ;;  %584 = vmatpush1.msra.mxu1 %v3880_v22 }
  0x3d   :  { %484 = vmatprep.subr.mxu0 %v4167_v7  ;;  %586 = vmatprep.subr.mxu1 %v3886_v24 }
  0x3e   :  { %487 = vmatpush1.msra.mxu0 %v4184_v60  ;;  %588 = vmatpush1.msra.mxu1 %v3909_v30 }
  0x3f   :  { %490 = vmatprep.subr.mxu0 %v4196_v6  ;;  %590 = vmatprep.subr.mxu1 %v5975_v33 }
  0x40   :  { %493 = vmatpush1.msra.mxu0 %v4223_v13  ;;  %592 = vmatpush1.msra.mxu1 %v5976_v32 }
  0x41   :  { %496 = vmatprep.subr.mxu0 %v4234_v53  ;;  %594 = vmatprep.subr.mxu1 %v5977_v55 }
  0x42   :  { %499 = vmatpush1.msra.mxu0 %v4251_v56  ;;  %596 = vmatpush1.msra.mxu1 %v5978_v12 }
  0x43   :  { %502 = vmatprep.subr.mxu0 %v4255_v51  ;;  %598 = vmatprep.subr.mxu1 %v5979_v18 }
  0x44   :  { %505 = vmatpush1.msra.mxu0 %v4265_v52  ;;  %600 = vmatpush1.msra.mxu1 %v5980_v25 }
  0x45   :  { %508 = vmatprep.subr.mxu0 %v4275_v36  ;;  %602 = vmatprep.subr.mxu1 %v5981_v50 }
  0x46   :  { %511 = vmatpush1.msra.mxu0 %v4284_v5  ;;  %604 = vmatpush1.msra.mxu1 %v5982_v26  ;;  %v6026_v5 = vld [vmem:[#allocation17_spill] sm:$0xff] }
  0x47   :  { %514 = vmatprep.subr.mxu0 %v4303_v37  ;;  %606 = vmatprep.subr.mxu1 %v5983_v46  ;;  %v5989_v46 = vld [vmem:[#allocation20_spill] sm:$0xff] }
  0x48   :  { %517 = vmatpush1.msra.mxu0 %v4310_v62  ;;  %608 = vmatpush1.msra.mxu1 %v5984_v1  ;;  %v5990_v62 = vand.u32 4294901760, %v3883_v23  ;;  %v5991_v1 = vld [vmem:[#allocation21_spill] sm:$0xff]  ;;  %v5996_v23 = vand.u32 4294901760, %v3937_v40  ;;  %v6001_v40 = vand.u32 4294901760, %v4015_v11  ;;  %v6017_v11 = vand.u32 4294901760, %v4265_v52  ;;  %v61_v52 = vld [vmem:[%s5801_s1 + $0x130] sm:$0xff] }
  0x49   :  { %520 = vmatprep.subr.mxu0 %v4321_v19  ;;  %610 = vmatprep.subr.mxu1 %v5985_v44  ;;  %v5992_v44 = vand.u32 4294901760, %v3906_v29  ;;  %v5997_v29 = vand.u32 4294901760, %v3953_v45  ;;  %v6002_v45 = vand.u32 4294901760, %v4029_v42  ;;  %v64_v42 = vld [vmem:[%s5801_s1 + $0x148] sm:$0xff] }
  0x4a   :  { %523 = vmatpush1.msra.mxu0 %v4325_v61  ;;  %612 = vmatpush1.msra.mxu1 %v4114_v43  ;;  %v5993_v61 = vld [vmem:[#allocation22_spill] sm:$0xff]  ;;  %v5994_v43 = vand.u32 4294901760, %v3912_v31  ;;  %v5998_v31 = vand.u32 4294901760, %v3986_v59  ;;  %v6003_v59 = vand.u32 4294901760, %v4046_v20 }
  0x4b   :  { %559 = vmatmul.mubr.f32.vlgmr.msra.gmra.mxu0 %v4279_v49  ;;  %614 = vmatprep.subr.mxu1 %v5986_v17 }
  0x4c   :  { %674 = vmatprep.subr.mxu0 %v5988_v63  ;;  %616 = vmatpush1.msra.mxu1 %v5989_v46  ;;  %v4523_v63 = vand.u32 4294901760, %v61_v52 }
  0x4d   :  { %678 = vmatpush1.msra.mxu0 %v5990_v62  ;;  %618 = vmatprep.subr.mxu1 %v5991_v1  ;;  %v6020_v62 = vand.u32 4294901760, %v4303_v37  ;;  %v6027_v37 = vld [vmem:[#allocation26_spill] sm:$0xff] }
  0x4e   :  { %682 = vmatprep.subr.mxu0 %v5992_v44  ;;  %620 = vmatpush1.msra.mxu1 %v5993_v61  ;;  %v6028_v44 = vand.u32 4294901760, %v6027_v37 }
  0x4f   :  { %686 = vmatpush1.msra.mxu0 %v5994_v43  ;;  %622 = vmatprep.subr.mxu1 %v4192_v58  ;;  %v5999_v43 = vld [vmem:[#allocation24_spill] sm:$0xff] }
  0x50   :  { %690 = vmatprep.subr.mxu0 %v5995_v38  ;;  %624 = vmatpush1.msra.mxu1 %v4209_v48 }
  0x51   :  { %694 = vmatpush1.msra.mxu0 %v5996_v23  ;;  %626 = vmatprep.subr.mxu1 %v4230_v34  ;;  %v49_v23 = vld [vmem:[%s5801_s1 + $0xd0] sm:$0xff] }
  0x52   :  { %698 = vmatprep.subr.mxu0 %v5997_v29  ;;  %628 = vmatpush1.msra.mxu1 %v4245_v4 }
  0x53   :  { %661 = vmatprep.mubr.f32.mxu1 %v5974_v54  ;;  %702 = vmatpush1.msra.mxu0 %v5998_v31 }
  0x54   :  { %665 = vmatmul.mubr.f32.vlgmr.msra.gmra.mxu1 %v5999_v43  ;;  %706 = vmatprep.subr.mxu0 %v6000_v35  ;;  %v46_v35 = vld [vmem:[%s5801_s1 + $0xb8] sm:$0xff] }
  0x55   :  { %840 = vmatprep.subr.mxu1 %v3823_v2  ;;  %710 = vmatpush1.msra.mxu0 %v6001_v40  ;;  %v6005_v2 = vand.u32 4294901760, %v4085_v47  ;;  %v6018_v47 = vand.u32 4294901760, %v4275_v36  ;;  %v6024_v36 = vld [vmem:[#allocation16_spill] sm:$0xff] }
  0x56   :  { %842 = vmatpush1.msra.mxu1 %v3825_v3  ;;  %714 = vmatprep.subr.mxu0 %v6002_v45  ;;  %v6006_v3 = vand.u32 4294901760, %v4101_v27 }
  0x57   :  { %844 = vmatprep.subr.mxu1 %v3838_v8  ;;  %718 = vmatpush1.msra.mxu0 %v6003_v59  ;;  %v6007_v8 = vand.u32 4294901760, %v4125_v39 }
  0x58   :  { %846 = vmatpush1.msra.mxu1 %v3840_v9  ;;  %722 = vmatprep.subr.mxu0 %v6004_v0  ;;  %v6008_v9 = vand.u32 4294901760, %v4141_v41  ;;  %v6021_v41 = vld [vmem:[#allocation15_spill] sm:$0xff] }
  0x59   :  { %848 = vmatprep.subr.mxu1 %v3842_v10  ;;  %726 = vmatpush1.msra.mxu0 %v6005_v2  ;;  %v6009_v10 = vand.u32 4294901760, %v4153_v28  ;;  %v67_v28 = vld [vmem:[%s5801_s1 + $0x160] sm:$0xff]  ;;  %v4597_v2 = vand.u32 4294901760, %v46_v35 }
  0x5a   :  { %850 = vmatpush1.msra.mxu1 %v3854_v14  ;;  %730 = vmatprep.subr.mxu0 %v6006_v3  ;;  %v6010_v14 = vand.u32 4294901760, %v4167_v7  ;;  %v70_v7 = vld [vmem:[%s5801_s1 + $0x178] sm:$0xff]  ;;  %v4495_v20 = vand.u32 4294901760, %v67_v28 }
  0x5b   :  { %852 = vmatprep.subr.mxu1 %v3856_v15  ;;  %734 = vmatpush1.msra.mxu0 %v6007_v8  ;;  %v6011_v15 = vand.u32 4294901760, %v4184_v60  ;;  %v4484_v39 = vand.u32 4294901760, %v70_v7  ;;  %v6022_v60 = vld [vmem:[#allocation25_spill] sm:$0xff] }
  0x5c   :  { %854 = vmatpush1.msra.mxu1 %v3858_v16  ;;  %738 = vmatprep.subr.mxu0 %v6008_v9  ;;  %v6012_v16 = vand.u32 4294901760, %v4196_v6  ;;  %v6023_v6 = vand.u32 4294901760, %v6022_v60 }
  0x5d   :  { %856 = vmatprep.subr.mxu1 %v3877_v21  ;;  %742 = vmatpush1.msra.mxu0 %v6009_v10  ;;  %v6013_v21 = vand.u32 4294901760, %v4223_v13  ;;  %v4507_v27 = vsub.f32 %v70_v7, %v4484_v39  ;;  %v4509_v13 = vand.u32 4294901760, %v64_v42  ;;  %v4624_v7 = vsub.f32 %v46_v35, %v4597_v2 }
  0x5e   :  { %858 = vmatpush1.msra.mxu1 %v3880_v22  ;;  %746 = vmatprep.subr.mxu0 %v6010_v14  ;;  %v6014_v22 = vand.u32 4294901760, %v4234_v53  ;;  %v58_v53 = vld [vmem:[%s5801_s1 + $0x118] sm:$0xff] }
  0x5f   :  { %860 = vmatprep.subr.mxu1 %v3886_v24  ;;  %750 = vmatpush1.msra.mxu0 %v6011_v15  ;;  %v6015_v24 = vand.u32 4294901760, %v4251_v56  ;;  %v6025_v56 = vand.u32 4294901760, %v4321_v19  ;;  %v4534_v19 = vsub.f32 %v64_v42, %v4509_v13 }
  0x60   :  { %862 = vmatpush1.msra.mxu1 %v3909_v30  ;;  %754 = vmatprep.subr.mxu0 %v6012_v16  ;;  %v6016_v30 = vand.u32 4294901760, %v4255_v51  ;;  %v4521_v51 = vsub.f32 %v67_v28, %v4495_v20  ;;  %v37_v16 = vld [vmem:[%s5801_s1 + $0x70] sm:$0xff] }
  0x61   :  { %864 = vmatprep.subr.mxu1 %v5975_v33  ;;  %758 = vmatpush1.msra.mxu0 %v6013_v21  ;;  %v55_v33 = vld [vmem:[%s5801_s1 + $0x100] sm:$0xff]  ;;  %v1051_v31 = vand.u32 4294901760, %v4534_v19 }
  0x62   :  { %866 = vmatpush1.msra.mxu1 %v5976_v32  ;;  %762 = vmatprep.subr.mxu0 %v6014_v22  ;;  %v6029_v32 = vld [vmem:[#allocation18_spill] sm:$0xff]  ;;  %v1044_v38 = vand.u32 4294901760, %v4521_v51 }
  0x63   :  { %868 = vmatprep.subr.mxu1 %v5977_v55  ;;  %766 = vmatpush1.msra.mxu0 %v6015_v24  ;;  %v4536_v55 = vand.u32 4294901760, %v58_v53  ;;  %v1052_v0 = vsub.f32 %v4534_v19, %v1051_v31 }
  0x64   :  { %870 = vmatpush1.msra.mxu1 %v5978_v12  ;;  %770 = vmatprep.subr.mxu0 %v6016_v30  ;;  %v1037_v12 = vand.u32 4294901760, %v4507_v27  ;;  %v1045_v40 = vsub.f32 %v4521_v51, %v1044_v38  ;;  %v34_v30 = vld [vmem:[%s5801_s1 + $0x58] sm:$0xff] }
  0x65   :  { %872 = vmatprep.subr.mxu1 %v5979_v18  ;;  %774 = vmatpush1.msra.mxu0 %v6017_v11  ;;  %v52_v18 = vld [vmem:[%s5801_s1 + $0xe8] sm:$0xff]  ;;  %v1053_v21 = vand.u32 4294901760, %v1052_v0 }
  0x66   :  { %874 = vmatpush1.msra.mxu1 %v5980_v25  ;;  %778 = vmatprep.subr.mxu0 %v6018_v47  ;;  %v6030_v25 = vld [vmem:[#allocation23_spill] sm:$0xff]  ;;  %v1038_v29 = vsub.f32 %v4507_v27, %v1037_v12  ;;  %v1046_v8 = vand.u32 4294901760, %v1045_v40 }
  0x67   :  { %876 = vmatprep.subr.mxu1 %v5981_v50  ;;  %782 = vmatpush1.msra.mxu0 %v6019_v57  ;;  %v4547_v50 = vsub.f32 %v61_v52, %v4523_v63  ;;  %v4644_v57 = vand.u32 4294901760, %v37_v16 }
  0x68   :  { %878 = vmatpush1.msra.mxu1 %v5982_v26  ;;  %786 = vmatprep.subr.mxu0 %v6020_v62  ;;  %v4549_v26 = vand.u32 4294901760, %v55_v33  ;;  %v1039_v59 = vand.u32 4294901760, %v1038_v29  ;;  %v31_v62 = vld [vmem:[%s5801_s1 + $0x40] sm:$0xff] }
  0x69   :  { %880 = vmatprep.subr.mxu1 %v6021_v41  ;;  %790 = vmatpush1.msra.mxu0 %v6023_v6  ;;  %v1058_v45 = vand.u32 4294901760, %v4547_v50  ;;  %v4658_v6 = vand.u32 4294901760, %v34_v30  ;;  %v4671_v37 = vsub.f32 %v37_v16, %v4644_v57 }
  0x6a   :  { %882 = vmatpush1.msra.mxu1 %v6024_v36  ;;  %794 = vmatprep.subr.mxu0 %v6025_v56  ;;  %v28_v56 = vld [vmem:[%s5801_s1 + $0x28] sm:$0xff] }
  0x6b   :  { %884 = vmatprep.subr.mxu1 %v6026_v5  ;;  %798 = vmatpush1.msra.mxu0 %v6028_v44  ;;  %v1059_v9 = vsub.f32 %v4547_v50, %v1058_v45  ;;  %v4673_v44 = vand.u32 4294901760, %v31_v62  ;;  %v4688_v35 = vand.u32 4294901760, %v28_v56 }
  0x6c   :  { %831 = vmatprep.mubr.f32.mxu0 %v5974_v54  ;;  %886 = vmatpush1.msra.mxu1 %v6029_v32 }
  0x6d   :  { %833 = vmatmul.mubr.f32.vlgmr.msra.gmra.mxu0 %v6030_v25  ;;  %888 = vmatprep.subr.mxu1 %v5986_v17  ;;  %v4557_v17 = vand.u32 4294901760, %v52_v18  ;;  %v1060_v11 = vand.u32 4294901760, %v1059_v9  ;;  %v4707_v16 = vsub.f32 %v28_v56, %v4688_v35 }
  0x6e   :  { %3425 = vmatprep.subr.mxu0 %v5974_v54  ;;  %890 = vmatpush1.msra.mxu1 %v5989_v46  ;;  %v4562_v46 = vsub.f32 %v58_v53, %v4536_v55  ;;  %v1093_v53 = vand.u32 4294901760, %v4624_v7 }
  0x6f   :  { %3426 = vmatpush3.msra.mxu0 %v4484_v39  ;;  %892 = vmatprep.subr.mxu1 %v5991_v1  ;;  %v4570_v1 = vand.u32 4294901760, %v49_v23 }
  0x70   :  { %3427 = vmatprep.subr.mxu0 %v5974_v54  ;;  %894 = vmatpush1.msra.mxu1 %v5993_v61  ;;  %v4578_v61 = vsub.f32 %v55_v33, %v4549_v26  ;;  %v1094_v29 = vsub.f32 %v4624_v7, %v1093_v53 }
  0x71   :  { %3428 = vmatpush3.msra.mxu0 %v4495_v20  ;;  %896 = vmatprep.subr.mxu1 %v4192_v58  ;;  %v4587_v58 = vsub.f32 %v52_v18, %v4557_v17  ;;  %v4603_v3 = vsub.f32 %v49_v23, %v4570_v1  ;;  %v25_v18 = vld [vmem:[%s5801_s1 + $0x10] sm:$0xff]  ;;  %v4683_v23 = vsub.f32 %v34_v30, %v4658_v6 }
  0x72   :  { %3429 = vmatprep.subr.mxu0 %v5974_v54  ;;  %898 = vmatpush1.msra.mxu1 %v4209_v48  ;;  %v43_v48 = vld [vmem:[%s5801_s1 + $0xa0] sm:$0xff]  ;;  %v1072_v14 = vand.u32 4294901760, %v4578_v61  ;;  %v1095_v9 = vand.u32 4294901760, %v1094_v29 }
  0x73   :  { %3430 = vmatpush3.msra.mxu0 %v4509_v13  ;;  %900 = vmatprep.subr.mxu1 %v4230_v34  ;;  %v1065_v34 = vand.u32 4294901760, %v4562_v46  ;;  %v4613_v10 = vand.u32 4294901760, %v43_v48  ;;  %v1079_v15 = vand.u32 4294901760, %v4587_v58  ;;  %v1086_v28 = vand.u32 4294901760, %v4603_v3 }
  0x74   :  { %3431 = vmatprep.subr.mxu0 %v5974_v54  ;;  %902 = vmatpush1.msra.mxu1 %v4245_v4  ;;  %v40_v4 = vld [vmem:[%s5801_s1 + $0x88] sm:$0xff]  ;;  %v1073_v47 = vsub.f32 %v4578_v61, %v1072_v14 }
  0x75   :  { %935 = vmatprep.mubr.f32.mxu1 %v5974_v54  ;;  %3432 = vmatpush3.msra.mxu0 %v4523_v63  ;;  %v1066_v22 = vsub.f32 %v4562_v46, %v1065_v34  ;;  %v4629_v24 = vand.u32 4294901760, %v40_v4  ;;  %v4639_v42 = vsub.f32 %v43_v48, %v4613_v10  ;;  %v1080_v52 = vsub.f32 %v4587_v58, %v1079_v15 }
  0x76   :  { %937 = vmatmul.mubr.f32.vlgmr.msra.gmra.mxu1 %v6030_v25  ;;  %3433 = vmatprep.subr.mxu0 %v5974_v54  ;;  %v1087_v36 = vsub.f32 %v4603_v3, %v1086_v28  ;;  %v1074_v5 = vand.u32 4294901760, %v1073_v47 }
  0x77   :  { %3460 = vmatprep.subr.mxu1 %v5974_v54  ;;  %3434 = vmatpush3.msra.mxu0 %v4536_v55  ;;  %v1067_v41 = vand.u32 4294901760, %v1066_v22  ;;  %v4656_v60 = vsub.f32 %v40_v4, %v4629_v24  ;;  %v1100_v33 = vand.u32 4294901760, %v4639_v42  ;;  %v1081_v32 = vand.u32 4294901760, %v1080_v52 }
  0x78   :  { %3461 = vmatpush3.msra.mxu1 %v1039_v59  ;;  %3435 = vmatprep.subr.mxu0 %v5974_v54  ;;  %v1088_v48 = vand.u32 4294901760, %v1087_v36  ;;  %v4695_v59 = vsub.f32 %v31_v62, %v4673_v44  ;;  %v4700_v4 = vand.u32 4294901760, %v25_v18  ;;  %v1121_v22 = vand.u32 4294901760, %v4683_v23 }
  0x79   :  { %3462 = vmatprep.subr.mxu1 %v5974_v54  ;;  %3436 = vmatpush3.msra.mxu0 %v4549_v26  ;;  %v1107_v40 = vand.u32 4294901760, %v4656_v60  ;;  %v1101_v0 = vsub.f32 %v4639_v42, %v1100_v33  ;;  %v1135_v36 = vand.u32 4294901760, %v4707_v16 }
  0x7a   :  { %3463 = vmatpush3.msra.mxu1 %v1046_v8  ;;  %3437 = vmatprep.subr.mxu0 %v5974_v54  ;;  %v1114_v8 = vand.u32 4294901760, %v4671_v37  ;;  %v1128_v52 = vand.u32 4294901760, %v4695_v59 }
  0x7b   :  { %3464 = vmatprep.subr.mxu1 %v5974_v54  ;;  %3438 = vmatpush3.msra.mxu0 %v4557_v17  ;;  %v1102_v30 = vand.u32 4294901760, %v1101_v0  ;;  %v1136_v29 = vsub.f32 %v4707_v16, %v1135_v36 }
  0x7c   :  { %3465 = vmatpush3.msra.mxu1 %v1053_v21  ;;  %3439 = vmatprep.subr.mxu0 %v5974_v54  ;;  %v1108_v21 = vsub.f32 %v4656_v60, %v1107_v40  ;;  %v1115_v47 = vsub.f32 %v4671_v37, %v1114_v8 }
  0x7d   :  { %3466 = vmatprep.subr.mxu1 %v5974_v54  ;;  %3440 = vmatpush3.msra.mxu0 %v4570_v1 }
  0x7e   :  { %3467 = vmatpush3.msra.mxu1 %v1060_v11  ;;  %3441 = vmatprep.subr.mxu0 %v5974_v54  ;;  %v4717_v11 = vsub.f32 %v25_v18, %v4700_v4  ;;  %v1109_v62 = vand.u32 4294901760, %v1108_v21  ;;  %v1116_v56 = vand.u32 4294901760, %v1115_v47  ;;  %v1137_v21 = vand.u32 4294901760, %v1136_v29  ;;  %v1620_v47 = vld [vmem:[%s5803_s3 + $0xc0] sm:$0xff] }
  0x7f   :  { %3468 = vmatprep.subr.mxu1 %v5974_v54  ;;  %3442 = vmatpush3.msra.mxu0 %v4597_v2 }
  0x80   :  { %3469 = vmatpush3.msra.mxu1 %v1067_v41  ;;  %3443 = vmatprep.subr.mxu0 %v5974_v54  ;;  %v1122_v41 = vsub.f32 %v4683_v23, %v1121_v22 }
  0x81   :  { %3470 = vmatprep.subr.mxu1 %v5974_v54  ;;  %3444 = vmatpush3.msra.mxu0 %v4613_v10 }
  0x82   :  { %3471 = vmatpush3.msra.mxu1 %v1074_v5  ;;  %3445 = vmatprep.subr.mxu0 %v5974_v54  ;;  %v1129_v5 = vsub.f32 %v4695_v59, %v1128_v52  ;;  %v1123_v18 = vand.u32 4294901760, %v1122_v41 }
  0x83   :  { %3472 = vmatprep.subr.mxu1 %v5974_v54  ;;  %3446 = vmatpush3.msra.mxu0 %v4629_v24 }
  0x84   :  { %3473 = vmatpush3.msra.mxu1 %v1081_v32  ;;  %3447 = vmatprep.subr.mxu0 %v5974_v54  ;;  %v1142_v32 = vand.u32 4294901760, %v4717_v11 }
  0x85   :  { %3474 = vmatprep.subr.mxu1 %v5974_v54  ;;  %3448 = vmatpush3.msra.mxu0 %v4644_v57 }
  0x86   :  { %3475 = vmatpush3.msra.mxu1 %v1088_v48  ;;  %3449 = vmatprep.subr.mxu0 %v5974_v54  ;;  %v1130_v48 = vand.u32 4294901760, %v1129_v5  ;;  %v1143_v0 = vsub.f32 %v4717_v11, %v1142_v32 }
  0x87   :  { %3476 = vmatprep.subr.mxu1 %v5974_v54  ;;  %3450 = vmatpush3.msra.mxu0 %v4658_v6 }
  0x88   :  { %3477 = vmatpush3.msra.mxu1 %v1095_v9  ;;  %3451 = vmatprep.subr.mxu0 %v5974_v54  ;;  %v6031_v9 = vld [vmem:[#allocation27_spill] sm:$0xff] }
  0x89   :  { %3478 = vmatprep.subr.mxu1 %v5974_v54  ;;  %3452 = vmatpush3.msra.mxu0 %v4673_v44 }
  0x8a   :  { %3479 = vmatpush3.msra.mxu1 %v1102_v30  ;;  %3453 = vmatprep.subr.mxu0 %v5974_v54  ;;  %v1144_v30 = vand.u32 4294901760, %v1143_v0  ;;  %v5030_v0 = vand.u32 4294901760, %v1620_v47 }
  0x8b   :  { %3480 = vmatprep.subr.mxu1 %v5974_v54  ;;  %3454 = vmatpush3.msra.mxu0 %v4688_v35 }
  0x8c   :  { %3481 = vmatpush3.msra.mxu1 %v1109_v62  ;;  %3455 = vmatprep.subr.mxu0 %v5974_v54 }
  0x8d   :  { %3482 = vmatprep.subr.mxu1 %v5974_v54  ;;  %3456 = vmatpush3.msra.mxu0 %v4700_v4 }
  0x8e   :  { %3483 = vmatpush3.msra.mxu1 %v1116_v56  ;;  %3457 = vmatprep.mubr.msk.f32.mxu0 %vm3783_vm0, %v5974_v54  ;;  %v1604_v56 = vld [vmem:[%s5803_s3 + $0x40] sm:$0xff] }
  0x8f   :  { %3484 = vmatprep.subr.mxu1 %v5974_v54  ;;  %3495 = vmatprep.subr.mxu0 %v5974_v54 }
  0x90   :  { %3458 = vmatmul.mubr.f32.vlgmr.msra.gmra.mxu0 %v6031_v9  ;;  %3485 = vmatpush3.msra.mxu1 %v1123_v18 }
  0x91   :  { %3496 = vmatpush3.msra.mxu0 %v4507_v27  ;;  %3486 = vmatprep.subr.mxu1 %v5974_v54  ;;  %v1610_v27 = vld [vmem:[%s5803_s3 + $0x70] sm:$0xff] }
  0x92   :  { %3497 = vmatprep.subr.mxu0 %v5974_v54  ;;  %3487 = vmatpush3.msra.mxu1 %v1130_v48 }
  0x93   :  { %3498 = vmatpush3.msra.mxu0 %v4521_v51  ;;  %3488 = vmatprep.subr.mxu1 %v5974_v54  ;;  %v1625_v51 = vld [vmem:[%s5803_s3 + $0xe8] sm:$0xff] }
  0x94   :  { %3499 = vmatprep.subr.mxu0 %v5974_v54  ;;  %3489 = vmatpush3.msra.mxu1 %v1137_v21  ;;  %v5044_v21 = vand.u32 4294901760, %v1604_v56 }
  0x95   :  { %3500 = vmatpush3.msra.mxu0 %v4534_v19  ;;  %3490 = vmatprep.subr.mxu1 %v5974_v54  ;;  %v1609_v19 = vld [vmem:[%s5803_s3 + $0x68] sm:$0xff] }
  0x96   :  { %3501 = vmatprep.subr.mxu0 %v5974_v54  ;;  %3491 = vmatpush3.msra.mxu1 %v1144_v30  ;;  %6041 = vst [vmem:[#allocation6_spill] sm:$0xff] %v5044_v21 }
  0x97   :  { %3492 = vmatprep.mubr.msk.f32.mxu1 %vm3783_vm0, %v5974_v54  ;;  %3502 = vmatpush3.msra.mxu0 %v4547_v50 }
  0x98   :  { %3493 = vmatmul.mubr.f32.vlgmr.msra.gmra.mxu1 %v6030_v25  ;;  %3503 = vmatprep.subr.mxu0 %v5974_v54 }
  0x99   :  { %3530 = vmatprep.subr.mxu1 %v5974_v54  ;;  %3504 = vmatpush3.msra.mxu0 %v4562_v46 }
  0x9a   :  { %3531 = vmatpush3.msra.mxu1 %v4484_v39  ;;  %3505 = vmatprep.subr.mxu0 %v5974_v54 }
  0x9b   :  { %3532 = vmatprep.subr.mxu1 %v5974_v54  ;;  %3506 = vmatpush3.msra.mxu0 %v4578_v61  ;;  %v1623_v61 = vld [vmem:[%s5803_s3 + $0xd8] sm:$0xff] }
  0x9c   :  { %3533 = vmatpush3.msra.mxu1 %v4495_v20  ;;  %3507 = vmatprep.subr.mxu0 %v5974_v54 }
  0x9d   :  { %3534 = vmatprep.subr.mxu1 %v5974_v54  ;;  %3508 = vmatpush3.msra.mxu0 %v4587_v58  ;;  %v1607_v58 = vld [vmem:[%s5803_s3 + $0x58] sm:$0xff] }
  0x9e   :  { %3535 = vmatpush3.msra.mxu1 %v4509_v13  ;;  %3509 = vmatprep.subr.mxu0 %v5974_v54 }
  0x9f   :  { %3536 = vmatprep.subr.mxu1 %v5974_v54  ;;  %3510 = vmatpush3.msra.mxu0 %v4603_v3 }
  0xa0   :  { %3537 = vmatpush3.msra.mxu1 %v4523_v63  ;;  %3511 = vmatprep.subr.mxu0 %v5974_v54 }
  0xa1   :  { %3538 = vmatprep.subr.mxu1 %v5974_v54  ;;  %3512 = vmatpush3.msra.mxu0 %v4624_v7  ;;  %v4949_v7 = vand.u32 4294901760, %v1623_v61 }
  0xa2   :  { %3539 = vmatpush3.msra.mxu1 %v4536_v55  ;;  %3513 = vmatprep.subr.mxu0 %v5974_v54 }
  0xa3   :  { %3540 = vmatprep.subr.mxu1 %v5974_v54  ;;  %3514 = vmatpush3.msra.mxu0 %v4639_v42  ;;  %v4998_v62 = vsub.f32 %v1623_v61, %v4949_v7 }
  0xa4   :  { %3541 = vmatpush3.msra.mxu1 %v4549_v26  ;;  %3515 = vmatprep.subr.mxu0 %v5974_v54 }
  0xa5   :  { %3542 = vmatprep.subr.mxu1 %v5974_v54  ;;  %3516 = vmatpush3.msra.mxu0 %v4656_v60  ;;  %6036 = vst [vmem:[#allocation11_spill] sm:$0xff] %v4998_v62 }
  0xa6   :  { %3543 = vmatpush3.msra.mxu1 %v4557_v17  ;;  %3517 = vmatprep.subr.mxu0 %v5974_v54 }
  0xa7   :  { %3544 = vmatprep.subr.mxu1 %v5974_v54  ;;  %3518 = vmatpush3.msra.mxu0 %v4671_v37  ;;  %v1621_v37 = vld [vmem:[%s5803_s3 + $0xc8] sm:$0xff] }
  0xa8   :  { %3545 = vmatpush3.msra.mxu1 %v4570_v1  ;;  %3519 = vmatprep.subr.mxu0 %v5974_v54  ;;  %v5000_v41 = vand.u32 4294901760, %v1621_v37 }
  0xa9   :  { %3546 = vmatprep.subr.mxu1 %v5974_v54  ;;  %3520 = vmatpush3.msra.mxu0 %v4683_v23 }
  0xaa   :  { %3547 = vmatpush3.msra.mxu1 %v4597_v2  ;;  %3521 = vmatprep.subr.mxu0 %v5974_v54 }
  0xab   :  { %3548 = vmatprep.subr.mxu1 %v5974_v54  ;;  %3522 = vmatpush3.msra.mxu0 %v4695_v59 }
  0xac   :  { %3549 = vmatpush3.msra.mxu1 %v4613_v10  ;;  %3523 = vmatprep.subr.mxu0 %v5974_v54 }
  0xad   :  { %3550 = vmatprep.subr.mxu1 %v5974_v54  ;;  %3524 = vmatpush3.msra.mxu0 %v4707_v16 }
  0xae   :  { %3551 = vmatpush3.msra.mxu1 %v4629_v24  ;;  %3525 = vmatprep.subr.mxu0 %v5974_v54 }
  0xaf   :  { %3552 = vmatprep.subr.mxu1 %v5974_v54  ;;  %3526 = vmatpush3.msra.mxu0 %v4717_v11 }
  0xb0   :  { %3527 = vmatprep.mubr.msk.f32.mxu0 %vm3783_vm0, %v5974_v54  ;;  %3553 = vmatpush3.msra.mxu1 %v4644_v57 }
  0xb1   :  { %3528 = vmatmul.mubr.f32.vlgmr.msra.gmra.mxu0 %v4279_v49  ;;  %3554 = vmatprep.subr.mxu1 %v5974_v54  ;;  %v1627_v49 = vld [vmem:[%s5803_s3 + $0xf8] sm:$0xff] }
  0xb2   :  { %3565 = vmatprep.subr.mxu0 %v5974_v54  ;;  %3555 = vmatpush3.msra.mxu1 %v4658_v6 }
  0xb3   :  { %3566 = vmatpush3.msra.mxu0 %v1037_v12  ;;  %3556 = vmatprep.subr.mxu1 %v5974_v54  ;;  %v1624_v12 = vld [vmem:[%s5803_s3 + $0xe0] sm:$0xff] }
  0xb4   :  { %3567 = vmatprep.subr.mxu0 %v5974_v54  ;;  %3557 = vmatpush3.msra.mxu1 %v4673_v44 }
  0xb5   :  { %3568 = vmatpush3.msra.mxu0 %v1044_v38  ;;  %3558 = vmatprep.subr.mxu1 %v5974_v54  ;;  %v4906_v38 = vand.u32 4294901760, %v1625_v51 }
  0xb6   :  { %3569 = vmatprep.subr.mxu0 %v5974_v54  ;;  %3559 = vmatpush3.msra.mxu1 %v4688_v35 }
  0xb7   :  { %3570 = vmatpush3.msra.mxu0 %v1051_v31  ;;  %3560 = vmatprep.subr.mxu1 %v5974_v54  ;;  %v4916_v31 = vand.u32 4294901760, %v1609_v19 }
  0xb8   :  { %3571 = vmatprep.subr.mxu0 %v5974_v54  ;;  %3561 = vmatpush3.msra.mxu1 %v4700_v4 }
  0xb9   :  { %3562 = vmatprep.mubr.msk.f32.mxu1 %vm3783_vm0, %v5974_v54  ;;  %3572 = vmatpush3.msra.mxu0 %v1058_v45  ;;  %v4958_v60 = vsub.f32 %v1609_v19, %v4916_v31 }
  0xba   :  { %3563 = vmatmul.mubr.f32.vlgmr.msra.gmra.mxu1 %v5999_v43  ;;  %3573 = vmatprep.subr.mxu0 %v5974_v54  ;;  %v1611_v43 = vld [vmem:[%s5803_s3 + $0x78] sm:$0xff] }
  0xbb   :  { %3600 = vmatprep.subr.mxu1 %v5974_v54  ;;  %3574 = vmatpush3.msra.mxu0 %v1065_v34 }
  0xbc   :  { %3601 = vmatpush3.msra.mxu1 %v4484_v39  ;;  %3575 = vmatprep.subr.mxu0 %v5974_v54  ;;  %v1626_v39 = vld [vmem:[%s5803_s3 + $0xf0] sm:$0xff] }
  0xbd   :  { %3602 = vmatprep.subr.mxu1 %v5974_v54  ;;  %3576 = vmatpush3.msra.mxu0 %v1072_v14  ;;  %v1622_v14 = vld [vmem:[%s5803_s3 + $0xd0] sm:$0xff] }
  0xbe   :  { %3603 = vmatpush3.msra.mxu1 %v4495_v20  ;;  %3577 = vmatprep.subr.mxu0 %v5974_v54  ;;  %v4873_v20 = vand.u32 4294901760, %v1627_v49  ;;  %v4972_v23 = vand.u32 4294901760, %v1622_v14 }
  0xbf   :  { %3604 = vmatprep.subr.mxu1 %v5974_v54  ;;  %3578 = vmatpush3.msra.mxu0 %v1079_v15 }
  0xc0   :  { %3605 = vmatpush3.msra.mxu1 %v4509_v13  ;;  %3579 = vmatprep.subr.mxu0 %v5974_v54  ;;  %6032 = vst [vmem:[#allocation7_spill] sm:$0xff] %v4873_v20  ;;  %v4880_v13 = vand.u32 4294901760, %v1611_v43  ;;  %v4904_v50 = vsub.f32 %v1627_v49, %v4873_v20  ;;  %v5028_v48 = vsub.f32 %v1622_v14, %v4972_v23  ;;  %v5873_v49 = vand.u32 4294901760, %v4998_v62  ;;  %v1603_v14 = vld [vmem:[%s5803_s3 + $0x38] sm:$0xff] }
  0xc1   :  { %3606 = vmatprep.subr.mxu1 %v5974_v54  ;;  %3580 = vmatpush3.msra.mxu0 %v1086_v28  ;;  %v1606_v28 = vld [vmem:[%s5803_s3 + $0x50] sm:$0xff] }
  0xc2   :  { %3607 = vmatpush3.msra.mxu1 %v4523_v63  ;;  %3581 = vmatprep.subr.mxu0 %v5974_v54  ;;  %v4888_v63 = vand.u32 4294901760, %v1626_v39  ;;  %6033 = vst [vmem:[#allocation8_spill] sm:$0xff] %v4904_v50  ;;  %v4914_v46 = vsub.f32 %v1611_v43, %v4880_v13  ;;  %v5882_v15 = vand.u32 4294901760, %v4904_v50  ;;  %6039 = vst [vmem:[#allocation14_spill] sm:$0xff] %v5028_v48  ;;  %v5880_v61 = vand.u32 4294901760, %v5028_v48 }
  0xc3   :  { %3608 = vmatprep.subr.mxu1 %v5974_v54  ;;  %3582 = vmatpush3.msra.mxu0 %v1093_v53  ;;  %v4960_v53 = vand.u32 4294901760, %v1607_v58  ;;  %v5056_v43 = vsub.f32 %v1621_v37, %v5000_v41 }
  0xc4   :  { %3609 = vmatpush3.msra.mxu1 %v4536_v55  ;;  %3583 = vmatprep.subr.mxu0 %v5974_v54  ;;  %v4895_v55 = vand.u32 4294901760, %v1610_v27  ;;  %v4925_v45 = vsub.f32 %v1626_v39, %v4888_v63  ;;  %v5881_v42 = vand.u32 4294901760, %v4914_v46 }
  0xc5   :  { %3610 = vmatprep.subr.mxu1 %v5974_v54  ;;  %3584 = vmatpush3.msra.mxu0 %v1100_v33  ;;  %v5014_v5 = vsub.f32 %v1607_v58, %v4960_v53  ;;  %6042 = vst [vmem:[#allocation20_spill] sm:$0xff] %v5056_v43  ;;  %v5084_v58 = vsub.f32 %v1620_v47, %v5030_v0 }
  0xc6   :  { %3611 = vmatpush3.msra.mxu1 %v4549_v26  ;;  %3585 = vmatprep.subr.mxu0 %v5974_v54  ;;  %v1608_v26 = vld [vmem:[%s5803_s3 + $0x60] sm:$0xff]  ;;  %v4935_v34 = vsub.f32 %v1610_v27, %v4895_v55  ;;  %v5010_v16 = vsub.f32 %v4914_v46, %v5881_v42  ;;  %v5099_v47 = vsub.f32 %v1604_v56, %v5044_v21  ;;  %v1602_v56 = vld [vmem:[%s5803_s3 + $0x30] sm:$0xff] }
  0xc7   :  { %3612 = vmatprep.subr.mxu1 %v5974_v54  ;;  %3586 = vmatpush3.msra.mxu0 %v1107_v40  ;;  %v4937_v3 = vand.u32 4294901760, %v1608_v26  ;;  %v1605_v40 = vld [vmem:[%s5803_s3 + $0x48] sm:$0xff]  ;;  %6037 = vst [vmem:[#allocation12_spill] sm:$0xff] %v5014_v5  ;;  %6044 = vst [vmem:[#allocation22_spill] sm:$0xff] %v5084_v58  ;;  %v5155_v42 = vand.u32 4294901760, %v1602_v56 }
  0xc8   :  { %3613 = vmatpush3.msra.mxu1 %v4557_v17  ;;  %3587 = vmatprep.subr.mxu0 %v5974_v54  ;;  %v4927_v17 = vand.u32 4294901760, %v1624_v12  ;;  %v5016_v18 = vand.u32 4294901760, %v1605_v40  ;;  %v1759_v39 = vand.u32 4294901760, %v5010_v16  ;;  %6045 = vst [vmem:[#allocation24_spill] sm:$0xff] %v5099_v47  ;;  %v5109_v16 = vsub.f32 %v4998_v62, %v5873_v49 }
  0xc9   :  { %3614 = vmatprep.subr.mxu1 %v5974_v54  ;;  %3588 = vmatpush3.msra.mxu0 %v1114_v8  ;;  %v5878_v8 = vand.u32 4294901760, %v4935_v34  ;;  %v4981_v59 = vsub.f32 %v1608_v26, %v4937_v3 }
  0xca   :  { %3615 = vmatpush3.msra.mxu1 %v4570_v1  ;;  %3589 = vmatprep.subr.mxu0 %v5974_v54  ;;  %v4947_v1 = vsub.f32 %v1625_v51, %v4906_v38  ;;  %v4970_v33 = vsub.f32 %v1624_v12, %v4927_v17  ;;  %6038 = vst [vmem:[#allocation13_spill] sm:$0xff] %v5016_v18  ;;  %v5876_v51 = vand.u32 4294901760, %v5014_v5  ;;  %v1619_v12 = vld [vmem:[%s5803_s3 + $0xb8] sm:$0xff] }
  0xcb   :  { %3616 = vmatprep.subr.mxu1 %v5974_v54  ;;  %3590 = vmatpush3.msra.mxu0 %v1121_v22  ;;  %6035 = vst [vmem:[#allocation10_spill] sm:$0xff] %v4981_v59  ;;  %v4983_v22 = vand.u32 4294901760, %v1606_v28  ;;  %v5038_v11 = vsub.f32 %v4935_v34, %v5878_v8  ;;  %v5069_v19 = vsub.f32 %v1605_v40, %v5016_v18  ;;  %v1601_v8 = vld [vmem:[%s5803_s3 + $0x28] sm:$0xff] }
  0xcc   :  { %3617 = vmatpush3.msra.mxu1 %v4597_v2  ;;  %3591 = vmatprep.subr.mxu0 %v5974_v54  ;;  %v5879_v2 = vand.u32 4294901760, %v4925_v45  ;;  %6034 = vst [vmem:[#allocation9_spill] sm:$0xff] %v4970_v33  ;;  %v5874_v29 = vand.u32 4294901760, %v4970_v33 }
  0xcd   :  { %3618 = vmatprep.subr.mxu1 %v5974_v54  ;;  %3592 = vmatpush3.msra.mxu0 %v1128_v52  ;;  %v5877_v52 = vand.u32 4294901760, %v4947_v1  ;;  %v5042_v9 = vsub.f32 %v1606_v28, %v4983_v22  ;;  %6043 = vst [vmem:[#allocation21_spill] sm:$0xff] %v5069_v19  ;;  %v1766_v28 = vand.u32 4294901760, %v5038_v11  ;;  %v5113_v11 = vand.u32 4294901760, %v1619_v12 }
  0xce   :  { %3619 = vmatpush3.msra.mxu1 %v4613_v10  ;;  %3593 = vmatprep.subr.mxu0 %v5974_v54  ;;  %v4994_v10 = vsub.f32 %v4904_v50, %v5882_v15  ;;  %v5079_v26 = vsub.f32 %v4970_v33, %v5874_v29  ;;  %v5886_v49 = vand.u32 4294901760, %v5069_v19  ;;  %v5127_v29 = vand.u32 4294901760, %v1603_v14  ;;  %v1616_v15 = vld [vmem:[%s5803_s3 + $0xa0] sm:$0xff] }
  0xcf   :  { %3620 = vmatprep.subr.mxu1 %v5974_v54  ;;  %3594 = vmatpush3.msra.mxu0 %v1135_v36  ;;  %v5875_v36 = vand.u32 4294901760, %v4958_v60  ;;  %6040 = vst [vmem:[#allocation19_spill] sm:$0xff] %v5042_v9  ;;  %v5883_v40 = vand.u32 4294901760, %v5042_v9 }
  0xd0   :  { %3621 = vmatpush3.msra.mxu1 %v4629_v24  ;;  %3595 = vmatprep.subr.mxu0 %v5974_v54  ;;  %v5024_v24 = vsub.f32 %v4925_v45, %v5879_v2  ;;  %v1871_v30 = vand.u32 4294901760, %v4994_v10  ;;  %v1618_v10 = vld [vmem:[%s5803_s3 + $0xb0] sm:$0xff] }
  0xd1   :  { %3622 = vmatprep.subr.mxu1 %v5974_v54  ;;  %3596 = vmatpush3.msra.mxu0 %v1142_v32  ;;  %v5872_v32 = vand.u32 4294901760, %v4981_v59  ;;  %v5065_v27 = vsub.f32 %v4958_v60, %v5875_v36  ;;  %v1617_v36 = vld [vmem:[%s5803_s3 + $0xa8] sm:$0xff] }
  0xd2   :  { %3597 = vmatprep.mubr.msk.f32.mxu0 %vm3783_vm0, %v5974_v54  ;;  %3623 = vmatpush3.msra.mxu1 %v4644_v57  ;;  %v5052_v57 = vsub.f32 %v4947_v1, %v5877_v52  ;;  %v5141_v52 = vand.u32 4294901760, %v1618_v10 }
  0xd3   :  { %3598 = vmatmul.mubr.f32.vlgmr.msra.gmra.mxu0 %v6030_v25  ;;  %3624 = vmatprep.subr.mxu1 %v5974_v54  ;;  %v5094_v37 = vsub.f32 %v4981_v59, %v5872_v32  ;;  %v1773_v32 = vand.u32 4294901760, %v5065_v27  ;;  %v5137_v27 = vsub.f32 %v5028_v48, %v5880_v61  ;;  %v5170_v61 = vand.u32 4294901760, %v1617_v36  ;;  %v1596_v59 = vld [vmem:[%s5803_s3] sm:$0xff] }
  0xd4   :  { %3625 = vmatpush3.msra.mxu1 %v4658_v6  ;;  %3632 = vmatprep.mubr.msk.f32.mxu1 %vm3783_vm0, %v5974_v54  ;;  %v1878_v6 = vand.u32 4294901760, %v5024_v24  ;;  %v5884_v24 = vand.u32 4294901760, %v5056_v43 }
  0xd5   :  { %3626 = vmatprep.subr.mxu1 %v5974_v54  ;;  %3161 = vmatprep.subr.mxu0 %v4873_v20  ;;  %v1780_v2 = vand.u32 4294901760, %v5094_v37 }
  0xd6   :  { %3627 = vmatpush3.msra.mxu1 %v4673_v44  ;;  %3162 = vmatpush3.msra.mxu0 %v4880_v13  ;;  %v1885_v44 = vand.u32 4294901760, %v5052_v57  ;;  %v5123_v57 = vsub.f32 %v5014_v5, %v5876_v51  ;;  %v5165_v37 = vsub.f32 %v5056_v43, %v5884_v24  ;;  %v1600_v51 = vld [vmem:[%s5803_s3 + $0x20] sm:$0xff]  ;;  %v1615_v24 = vld [vmem:[%s5803_s3 + $0x98] sm:$0xff] }
  0xd7   :  { %3628 = vmatprep.subr.mxu1 %v5974_v54  ;;  %3163 = vmatprep.subr.mxu0 %v4888_v63 }
  0xd8   :  { %3629 = vmatpush3.msra.mxu1 %v4688_v35  ;;  %3164 = vmatpush3.msra.mxu0 %v4895_v55  ;;  %v1892_v35 = vand.u32 4294901760, %v5079_v26  ;;  %v5151_v26 = vsub.f32 %v5042_v9, %v5883_v40  ;;  %v5168_v40 = vsub.f32 %v1619_v12, %v5113_v11  ;;  %v5185_v12 = vand.u32 4294901760, %v1601_v8 }
  0xd9   :  { %3630 = vmatprep.subr.mxu1 %v5974_v54  ;;  %3165 = vmatprep.subr.mxu0 %v4906_v38 }
  0xda   :  { %3631 = vmatpush3.msra.mxu1 %v4700_v4  ;;  %3166 = vmatpush3.msra.mxu0 %v4916_v31  ;;  %v1899_v4 = vand.u32 4294901760, %v5109_v16  ;;  %6046 = vst [vmem:[#allocation15_spill] sm:$0xff] %v5168_v40  ;;  %v5183_v16 = vsub.f32 %v1603_v14, %v5127_v29  ;;  %v5200_v14 = vand.u32 4294901760, %v1616_v15  ;;  %v6053_v62 = vand.u32 4294901760, %v5168_v40 }
  0xdb   :  { %3633 = vmatmul.mubr.f32.vlgmr.msra.gmra.mxu1 %v6030_v25  ;;  %3196 = vmatprep.subr.mxu1 %v1871_v30  ;;  %v1787_v25 = vand.u32 4294901760, %v5123_v57  ;;  %v5179_v30 = vsub.f32 %v5069_v19, %v5886_v49  ;;  %v6048_v57 = vand.u32 4294901760, %v5084_v58  ;;  %v5198_v49 = vsub.f32 %v1618_v10, %v5141_v52  ;;  %v1599_v19 = vld [vmem:[%s5803_s3 + $0x18] sm:$0xff] }
  0xdc   :  { %3197 = vmatpush3.msra.mxu1 %v1759_v39  ;;  %3167 = vmatprep.subr.mxu0 %v4927_v17  ;;  %6047 = vst [vmem:[#allocation25_spill] sm:$0xff] %v5183_v16  ;;  %v1906_v39 = vand.u32 4294901760, %v5137_v27  ;;  %v6050_v27 = vand.u32 4294901760, %v5099_v47  ;;  %v5215_v10 = vand.u32 4294901760, %v1600_v51 }
  0xdd   :  { %3198 = vmatprep.subr.mxu1 %v1878_v6  ;;  %v5194_v54 = vsub.f32 %v5084_v58, %v6048_v57  ;;  %3168 = vmatpush3.msra.mxu0 %v4937_v3  ;;  %6049 = vst [vmem:[#allocation16_spill] sm:$0xff] %v5198_v49  ;;  %v1794_v6 = vand.u32 4294901760, %v5151_v26  ;;  %v5213_v57 = vsub.f32 %v1602_v56, %v5155_v42  ;;  %v1614_v58 = vld [vmem:[%s5803_s3 + $0x90] sm:$0xff]  ;;  %v1801_v9 = vand.u32 4294901760, %v5179_v30 }
  0xde   :  { %3199 = vmatpush3.msra.mxu1 %v1766_v28  ;;  %v5209_v43 = vsub.f32 %v5099_v47, %v6050_v27  ;;  %3169 = vmatprep.subr.mxu0 %v4949_v7  ;;  %v1913_v28 = vand.u32 4294901760, %v5165_v37  ;;  %v5224_v27 = vsub.f32 %v1617_v36, %v5170_v61  ;;  %v5226_v47 = vand.u32 4294901760, %v1615_v24  ;;  %v1598_v56 = vld [vmem:[%s5803_s3 + $0x10] sm:$0xff]  ;;  %v1613_v36 = vld [vmem:[%s5803_s3 + $0x88] sm:$0xff] }
  0xdf   :  { %6051 = vst [vmem:[#allocation17_spill] sm:$0xff] %v5213_v57  ;;  %3200 = vmatprep.subr.mxu1 %v1885_v44  ;;  %3170 = vmatpush3.msra.mxu0 %v4960_v53  ;;  %v5235_v37 = vsub.f32 %v1601_v8, %v5185_v12  ;;  %v5237_v26 = vand.u32 4294901760, %v1599_v19  ;;  %v1920_v48 = vand.u32 4294901760, %v5194_v54  ;;  %v5246_v30 = vsub.f32 %v1616_v15, %v5200_v14  ;;  %v1597_v8 = vld [vmem:[%s5803_s3 + $0x8] sm:$0xff]  ;;  %v1612_v15 = vld [vmem:[%s5803_s3 + $0x80] sm:$0xff] }
  0xe0   :  { %3201 = vmatpush3.msra.mxu1 %v1773_v32  ;;  %3171 = vmatprep.subr.mxu0 %v4972_v23  ;;  %v5248_v44 = vand.u32 4294901760, %v1614_v58  ;;  %v1808_v5 = vand.u32 4294901760, %v5209_v43  ;;  %v5257_v54 = vsub.f32 %v1600_v51, %v5215_v10  ;;  %v5259_v32 = vand.u32 4294901760, %v1598_v56 }
  0xe1   :  { %3202 = vmatprep.subr.mxu1 %v1892_v35  ;;  %3172 = vmatpush3.msra.mxu0 %v4983_v22  ;;  %v5270_v35 = vsub.f32 %v1615_v24, %v5226_v47  ;;  %v5272_v51 = vand.u32 4294901760, %v1613_v36  ;;  %v5283_v43 = vsub.f32 %v1599_v19, %v5237_v26  ;;  %v5285_v24 = vand.u32 4294901760, %v1597_v8 }
  0xe2   :  { %3203 = vmatpush3.msra.mxu1 %v1780_v2  ;;  %3173 = vmatprep.subr.mxu0 %v5000_v41  ;;  %6052 = vst [vmem:[#allocation26_spill] sm:$0xff] %v5257_v54  ;;  %v1926_v2 = vsub.f32 %v5168_v40, %v6053_v62  ;;  %v6057_v40 = vand.u32 4294901760, %v5198_v49  ;;  %v5295_v62 = vand.u32 4294901760, %v1612_v15  ;;  %v6059_v19 = vand.u32 4294901760, %v5213_v57 }
  0xe3   :  { %3204 = vmatprep.subr.mxu1 %v1899_v4  ;;  %3174 = vmatpush3.msra.mxu0 %v5016_v18  ;;  %6054 = vst [vmem:[#allocation18_spill] sm:$0xff] %v5270_v35  ;;  %v6055_v4 = vand.u32 4294901760, %v5183_v16  ;;  %6056 = vst [vmem:[#allocation23_spill] sm:$0xff] %v5283_v43 }
  0xe4   :  { %3205 = vmatpush3.msra.mxu1 %v1787_v25  ;;  %3175 = vmatprep.subr.mxu0 %v5030_v0  ;;  %v1933_v18 = vsub.f32 %v5198_v49, %v6057_v40  ;;  %v5303_v40 = vsub.f32 %v1598_v56, %v5259_v32  ;;  %v5305_v25 = vand.u32 4294901760, %v1596_v59  ;;  %v1927_v49 = vand.u32 4294901760, %v1926_v2 }
  0xe5   :  { %v1814_v33 = vsub.f32 %v5183_v16, %v6055_v4  ;;  %3206 = vmatprep.subr.mxu1 %v1906_v39  ;;  %3176 = vmatpush3.msra.mxu0 %v5044_v21  ;;  %v5293_v4 = vsub.f32 %v1614_v58, %v5248_v44  ;;  %v1821_v16 = vsub.f32 %v5213_v57, %v6059_v19  ;;  %v6061_v58 = vand.u32 4294901760, %v5224_v27 }
  0xe6   :  { %3207 = vmatpush3.msra.mxu1 %v1794_v6  ;;  %3177 = vmatprep.subr.mxu0 %v5113_v11  ;;  %6060 = vst [vmem:[#allocation28_spill] sm:$0xff] %v5303_v40  ;;  %v5313_v19 = vsub.f32 %v1613_v36, %v5272_v51  ;;  %v6063_v56 = vand.u32 4294901760, %v5235_v37  ;;  %v5321_v2 = vsub.f32 %v1597_v8, %v5285_v24  ;;  %v6065_v6 = vand.u32 4294901760, %v5246_v30 }
  0xe7   :  { %6058 = vst [vmem:[#allocation27_spill] sm:$0xff] %v5293_v4  ;;  %3208 = vmatprep.subr.mxu1 %v1913_v28  ;;  %v1940_v21 = vsub.f32 %v5224_v27, %v6061_v58  ;;  %3178 = vmatpush3.msra.mxu0 %v5127_v29  ;;  %v1815_v39 = vand.u32 4294901760, %v1814_v33  ;;  %v1934_v58 = vand.u32 4294901760, %v1933_v18  ;;  %v5329_v33 = vsub.f32 %v1612_v15, %v5295_v62 }
  0xe8   :  { %6062 = vst [vmem:[#allocation29_spill] sm:$0xff] %v5313_v19  ;;  %3209 = vmatpush3.msra.mxu1 %v1801_v9  ;;  %v1828_v57 = vsub.f32 %v5235_v37, %v6063_v56  ;;  %3179 = vmatprep.subr.mxu0 %v5141_v52  ;;  %6064 = vst [vmem:[#allocation30_spill] sm:$0xff] %v5321_v2  ;;  %v1947_v36 = vsub.f32 %v5246_v30, %v6065_v6  ;;  %v1822_v56 = vand.u32 4294901760, %v1821_v16 }
  0xe9   :  { %3210 = vmatprep.subr.mxu1 %v1920_v48  ;;  %3180 = vmatpush3.msra.mxu0 %v5155_v42  ;;  %6066 = vst [vmem:[#allocation31_spill] sm:$0xff] %v5329_v33  ;;  %v6067_v28 = vand.u32 4294901760, %v5257_v54  ;;  %v5337_v18 = vsub.f32 %v1596_v59, %v5305_v25  ;;  %v1941_v6 = vand.u32 4294901760, %v1940_v21  ;;  %v6069_v9 = vand.u32 4294901760, %v5270_v35 }
  0xea   :  { %3211 = vmatpush3.msra.mxu1 %v1808_v5  ;;  %3181 = vmatprep.subr.mxu0 %v5170_v61  ;;  %v5923_v5 = vand.u32 4294901760, %v5313_v19  ;;  %v1829_v16 = vand.u32 4294901760, %v1828_v57  ;;  %v1948_v59 = vand.u32 4294901760, %v1947_v36  ;;  %v6071_v21 = vand.u32 4294901760, %v5293_v4 }
  0xeb   :  { %v1835_v8 = vsub.f32 %v5257_v54, %v6067_v28  ;;  %6068 = vst [vmem:[#allocation32_spill] sm:$0xff] %v5337_v18  ;;  %3212 = vmatprep.subr.mxu1 %v1927_v49  ;;  %v1954_v15 = vsub.f32 %v5270_v35, %v6069_v9  ;;  %3182 = vmatpush3.msra.mxu0 %v5185_v12  ;;  %v6070_v28 = vand.u32 4294901760, %v5283_v43  ;;  %v5922_v9 = vand.u32 4294901760, %v5329_v33 }
  0xec   :  { %3213 = vmatpush3.msra.mxu1 %v1815_v39  ;;  %3183 = vmatprep.subr.mxu0 %v5200_v14  ;;  %v1961_v49 = vsub.f32 %v5293_v4, %v6071_v21  ;;  %v6072_v39 = vand.u32 4294901760, %v5303_v40  ;;  %v5921_v54 = vand.u32 4294901760, %v5337_v18  ;;  %v1968_v36 = vsub.f32 %v5313_v19, %v5923_v5 }
  0xed   :  { %v1842_v48 = vsub.f32 %v5283_v43, %v6070_v28  ;;  %3214 = vmatprep.subr.mxu1 %v1934_v58  ;;  %3184 = vmatpush3.msra.mxu0 %v5215_v10  ;;  %v1836_v57 = vand.u32 4294901760, %v1835_v8  ;;  %v1955_v58 = vand.u32 4294901760, %v1954_v15 }
  0xee   :  { %3215 = vmatpush3.msra.mxu1 %v1822_v56  ;;  %v1849_v28 = vsub.f32 %v5303_v40, %v6072_v39  ;;  %3185 = vmatprep.subr.mxu0 %v5226_v47  ;;  %v6073_v56 = vand.u32 4294901760, %v5321_v2  ;;  %v1962_v39 = vand.u32 4294901760, %v1961_v49 }
  0xef   :  { %3216 = vmatprep.subr.mxu1 %v1941_v6  ;;  %3186 = vmatpush3.msra.mxu0 %v5237_v26  ;;  %v1843_v21 = vand.u32 4294901760, %v1842_v48  ;;  %v1975_v6 = vsub.f32 %v5329_v33, %v5922_v9  ;;  %v1863_v48 = vsub.f32 %v5337_v18, %v5921_v54 }
  0xf0   :  { %3217 = vmatpush3.msra.mxu1 %v1829_v16  ;;  %v1856_v8 = vsub.f32 %v5321_v2, %v6073_v56  ;;  %3187 = vmatprep.subr.mxu0 %v5248_v44  ;;  %v1850_v15 = vand.u32 4294901760, %v1849_v28  ;;  %v1969_v16 = vand.u32 4294901760, %v1968_v36  ;;  %v73_v28 = vlaneseq  ;;  %v191_v56 = vpop.f32.mrf.mxu0 }
  0xf1   :  { %3218 = vmatprep.subr.mxu1 %v1948_v59  ;;  %3188 = vmatpush3.msra.mxu0 %v5259_v32  ;;  %v1976_v49 = vand.u32 4294901760, %v1975_v6 }
  0xf2   :  { %3219 = vmatpush3.msra.mxu1 %v1836_v57  ;;  %3189 = vmatprep.subr.mxu0 %v5272_v51  ;;  %v1857_v59 = vand.u32 4294901760, %v1856_v8  ;;  %v1864_v57 = vand.u32 4294901760, %v1863_v48  ;;  %v193_v6 = vpop.f32.mrf.mxu0 }
  0xf3   :  { %3220 = vmatprep.subr.mxu1 %v1955_v58  ;;  %3190 = vmatpush3.msra.mxu0 %v5285_v24  ;;  %v5380_v58 = vshrl.u32 %v73_v28, 7 }
  0xf4   :  { %3221 = vmatpush3.msra.mxu1 %v1843_v21  ;;  %3191 = vmatprep.subr.mxu0 %v5295_v62  ;;  %v5386_v21 = vld [vmem:[%s5802_s2] sm:$0x7] }
  0xf5   :  { %3222 = vmatprep.subr.mxu1 %v1962_v39  ;;  %3192 = vmatpush3.msra.mxu0 %v5305_v25  ;;  %6074 = vst [vmem:[#allocation33_spill] sm:$0xff] %v5380_v58  ;;  %v75_v36 = vsub.s32 0, %v5380_v58  ;;  %6075 = vst [vmem:[#allocation34_spill] sm:$0xff] %v5386_v21  ;;  %v79_v8 = vsub.s32 1, %v5380_v58 }
  0xf6   :  { %3223 = vmatpush3.msra.mxu1 %v1850_v15  ;;  %3231 = vmatprep.subr.mxu0 %v4904_v50  ;;  %v423_v15 = vpop.f32.mrf.mxu1 }
  0xf7   :  { %3224 = vmatprep.subr.mxu1 %v1969_v16  ;;  %v76_v39 = vrot.slane %v5386_v21, %v75_v36  ;;  %v80_v48 = vrot.slane %v5386_v21, %v79_v8 }
  0xf8   :  { %3225 = vmatpush3.msra.mxu1 %v1857_v59 }
  0xf9   :  { %3226 = vmatprep.subr.mxu1 %v1976_v49  ;;  %v192_v59 = vadd.f32 %v191_v56, %v76_v39  ;;  %v425_v49 = vpop.f32.mrf.mxu1 }
  0xfa   :  { %3227 = vmatpush3.msra.mxu1 %v1864_v57  ;;  %v194_v57 = vadd.f32 %v193_v6, %v80_v48 }
  0xfb   :  { %3266 = vmatprep.subr.mxu1 %v4873_v20  ;;  %v424_v9 = vadd.f32 %v423_v15, %v192_v59 }
  0xfc   :  { %v426_v50 = vadd.f32 %v425_v49, %v194_v57  ;;  %v6078_v57 = vld [vmem:[#allocation13_spill] sm:$0xff] }
 0x10b   :  { %v560_v16 = vpop.f32.mrf.mxu0 }
 0x10c   :  { %v561_v18 = vadd.f32 %v560_v16, %v424_v9 }
 0x10d   :  { %v562_v28 = vpop.f32.mrf.mxu0 }
 0x10e   :  { %v563_v2 = vadd.f32 %v562_v28, %v426_v50  ;;  %v6079_v28 = vld [vmem:[#allocation9_spill] sm:$0xff] }
 0x114   :  { %v666_v54 = vpop.f32.mrf.mxu1 }
 0x115   :  { %v667_v19 = vadd.f32 %v666_v54, %v561_v18 }
 0x116   :  { %v668_v33 = vpop.f32.mrf.mxu1 }
 0x117   :  { %v669_v40 = vadd.f32 %v668_v33, %v563_v2 }
 0x12d   :  { %v834_v5 = vpop.f32.mrf.mxu0 }
 0x12e   :  { %v835_v36 = vadd.f32 %v834_v5, %v667_v19 }
 0x12f   :  { %v836_v58 = vpop.f32.mrf.mxu0 }
 0x130   :  { %v837_v43 = vadd.f32 %v836_v58, %v669_v40 }
 0x136   :  { %v938_v4 = vpop.f32.mrf.mxu1 }
 0x137   :  { %v939_v20 = vadd.f32 %v938_v4, %v835_v36  ;;  %v6080_v36 = vld [vmem:[#allocation10_spill] sm:$0xff] }
 0x138   :  { %v940_v8 = vpop.f32.mrf.mxu1 }
 0x139   :  { %v1584_v21 = vmul.f32 0.5, %v939_v20  ;;  %v941_v56 = vadd.f32 %v940_v8, %v837_v43  ;;  %v6081_v8 = vld [vmem:[#allocation6_spill] sm:$0xff] }
 0x13b   :  { %3754 = vtanh.f32 %v1584_v21  ;;  %v1585_v39 = vmul.f32 0.5, %v941_v56  ;;  %v6082_v56 = vld [vmem:[#allocation11_spill] sm:$0xff] }
 0x13d   :  { %3756 = vtanh.f32 %v1585_v39  ;;  %v6083_v39 = vld [vmem:[#allocation12_spill] sm:$0xff] }
 0x148   :  { %v3755_v6 = vpop.eup %3754 }
 0x149   :  { %v1590_v15 = vmul.f32 0.5, %v3755_v6  ;;  %v6084_v6 = vld [vmem:[#allocation14_spill] sm:$0xff] }
 0x14a   :  { %v3757_v48 = vpop.eup %3756 }
 0x14b   :  { %v1593_v59 = vadd.f32 0.5, %v1590_v15  ;;  %v1591_v9 = vmul.f32 0.5, %v3757_v48  ;;  %v6085_v15 = vld [vmem:[#allocation19_spill] sm:$0xff]  ;;  %v6086_v48 = vld [vmem:[#allocation20_spill] sm:$0xff] }
 0x14d   :  { %v5391_v16 = vand.u32 4294901760, %v1593_v59  ;;  %v1594_v50 = vadd.f32 0.5, %v1591_v9  ;;  %v6088_v9 = vld [vmem:[#allocation22_spill] sm:$0xff] }
 0x14f   :  { %6076 = vst [vmem:[#allocation35_spill] sm:$0xff] %v5391_v16  ;;  %v5394_v54 = vsub.f32 %v1593_v59, %v5391_v16  ;;  %v5396_v19 = vand.u32 4294901760, %v1594_v50  ;;  %v6087_v59 = vld [vmem:[#allocation21_spill] sm:$0xff] }
 0x150   :  { %v5398_v4 = vpop.f32.mrf.mxu0 }
 0x151   :  { %v1739_v20 = vsub.f32 %v1594_v50, %v5396_v19  ;;  %1979 = vmatprep.mubr.f32.mxu1 %v5396_v19  ;;  %v1746_v43 = vand.u32 4294901760, %v5394_v54  ;;  %v6089_v50 = vld [vmem:[#allocation24_spill] sm:$0xff] }
 0x152   :  { %1981 = vmatmul.mubr.f32.vlgmr.msra.gmra.mxu1 %v5391_v16  ;;  %v3459_v40 = vpop.f32.mrf.mxu0  ;;  %v6097_v16 = vld [vmem:[#allocation23_spill] sm:$0xff] }
 0x153   :  { %3267 = vmatpush3.msra.mxu1 %v4880_v13  ;;  %v1740_v2 = vand.u32 4294901760, %v1739_v20  ;;  %v1747_v33 = vsub.f32 %v5394_v54, %v1746_v43  ;;  %v6091_v40 = vld [vmem:[#allocation25_spill] sm:$0xff] }
 0x154   :  { %3268 = vmatprep.subr.mxu1 %v4888_v63 }
 0x155   :  { %3269 = vmatpush3.msra.mxu1 %v4895_v55  ;;  %2223 = vmatprep.mubr.f32.mxu1 %v1740_v2  ;;  %v1741_v18 = vsub.f32 %v1739_v20, %v1740_v2  ;;  %v1748_v21 = vand.u32 4294901760, %v1747_v33  ;;  %v6092_v2 = vld [vmem:[#allocation16_spill] sm:$0xff]  ;;  %v6093_v33 = vld [vmem:[#allocation17_spill] sm:$0xff] }
 0x156   :  { %3270 = vmatprep.subr.mxu1 %v4906_v38 }
 0x157   :  { %3271 = vmatpush3.msra.mxu1 %v4916_v31  ;;  %v1742_v5 = vand.u32 4294901760, %v1741_v18 }
 0x158   :  { %v5412_v58 = vpop.f32.mrf.mxu1  ;;  %3272 = vmatprep.subr.mxu1 %v4927_v17 }
 0x159   :  { %6077 = vst [vmem:[#allocation36_spill] sm:$0xff] %v5412_v58  ;;  %3273 = vmatpush3.msra.mxu1 %v4937_v3  ;;  %1743 = vmatprep.mubr.f32.mxu0 %v1742_v5  ;;  %v6095_v5 = vld [vmem:[#allocation26_spill] sm:$0xff]  ;;  %v6099_v58 = vld [vmem:[#allocation28_spill] sm:$0xff] }
 0x15a   :  { %v3494_v49 = vpop.f32.mrf.mxu1  ;;  %3274 = vmatprep.subr.mxu1 %v4949_v7  ;;  %1749 = vmatmul.mubr.f32.vlgmr.msra.gmra.mxu0 %v1748_v21  ;;  %v6096_v21 = vld [vmem:[#allocation7_spill] sm:$0xff] }
 0x15b   :  { %3232 = vmatpush3.msra.mxu0 %v4914_v46  ;;  %3275 = vmatpush3.msra.mxu1 %v4960_v53 }
 0x15c   :  { %3233 = vmatprep.subr.mxu0 %v4925_v45  ;;  %2116 = vmatprep.mubr.f32.mxu0 %v1739_v20  ;;  %v6090_v20 = vld [vmem:[#allocation15_spill] sm:$0xff] }
 0x15d   :  { %3276 = vmatprep.subr.mxu1 %v4972_v23  ;;  %3234 = vmatpush3.msra.mxu0 %v4935_v34 }
 0x15e   :  { %3277 = vmatpush3.msra.mxu1 %v4983_v22  ;;  %3235 = vmatprep.subr.mxu0 %v4947_v1 }
 0x15f   :  { %3278 = vmatprep.subr.mxu1 %v5000_v41  ;;  %3236 = vmatpush3.msra.mxu0 %v4958_v60 }
 0x160   :  { %3279 = vmatpush3.msra.mxu1 %v6078_v57  ;;  %3237 = vmatprep.subr.mxu0 %v6079_v28 }
 0x161   :  { %3280 = vmatprep.subr.mxu1 %v5030_v0  ;;  %3238 = vmatpush3.msra.mxu0 %v6080_v36 }
 0x162   :  { %3281 = vmatpush3.msra.mxu1 %v6081_v8  ;;  %3239 = vmatprep.subr.mxu0 %v6082_v56 }
 0x163   :  { %3282 = vmatprep.subr.mxu1 %v5113_v11  ;;  %3240 = vmatpush3.msra.mxu0 %v6083_v39 }
 0x164   :  { %3283 = vmatpush3.msra.mxu1 %v5127_v29  ;;  %3241 = vmatprep.subr.mxu0 %v6084_v6 }
 0x165   :  { %3284 = vmatprep.subr.mxu1 %v5141_v52  ;;  %3242 = vmatpush3.msra.mxu0 %v6085_v15 }
 0x166   :  { %3285 = vmatpush3.msra.mxu1 %v5155_v42  ;;  %3243 = vmatprep.subr.mxu0 %v6086_v48 }
 0x167   :  { %3286 = vmatprep.subr.mxu1 %v5170_v61  ;;  %3244 = vmatpush3.msra.mxu0 %v6087_v59 }
 0x168   :  { %3287 = vmatpush3.msra.mxu1 %v5185_v12  ;;  %3245 = vmatprep.subr.mxu0 %v6088_v9 }
 0x169   :  { %3288 = vmatprep.subr.mxu1 %v5200_v14  ;;  %3246 = vmatpush3.msra.mxu0 %v6089_v50 }
 0x16a   :  { %3289 = vmatpush3.msra.mxu1 %v5215_v10  ;;  %3247 = vmatprep.subr.mxu0 %v6090_v20 }
 0x16b   :  { %3290 = vmatprep.subr.mxu1 %v5226_v47  ;;  %3248 = vmatpush3.msra.mxu0 %v6091_v40 }
 0x16c   :  { %3291 = vmatpush3.msra.mxu1 %v5237_v26  ;;  %3249 = vmatprep.subr.mxu0 %v6092_v2 }
 0x16d   :  { %3292 = vmatprep.subr.mxu1 %v5248_v44  ;;  %3250 = vmatpush3.msra.mxu0 %v6093_v33 }
 0x16e   :  { %3293 = vmatpush3.msra.mxu1 %v5259_v32  ;;  %3251 = vmatprep.subr.mxu0 %v5224_v27 }
 0x16f   :  { %3294 = vmatprep.subr.mxu1 %v5272_v51  ;;  %3252 = vmatpush3.msra.mxu0 %v5235_v37 }
 0x170   :  { %3295 = vmatpush3.msra.mxu1 %v5285_v24  ;;  %3253 = vmatprep.subr.mxu0 %v5246_v30 }
 0x171   :  { %v5460_v18 = vpop.f32.mrf.mxu0  ;;  %3296 = vmatprep.subr.mxu1 %v5295_v62  ;;  %3254 = vmatpush3.msra.mxu0 %v6095_v5 }
 0x172   :  { %6094 = vst [vmem:[#allocation13_spill] sm:$0xff] %v5460_v18  ;;  %3297 = vmatpush3.msra.mxu1 %v5305_v25  ;;  %3255 = vmatprep.subr.mxu0 %v5270_v35  ;;  %v6098_v18 = vld [vmem:[#allocation27_spill] sm:$0xff]  ;;  %v6100_v35 = vld [vmem:[#allocation29_spill] sm:$0xff] }
 0x173   :  { %2227 = vmatmul.mubr.f32.vlgmr.msra.gmra.mxu1 %v1746_v43  ;;  %3336 = vmatprep.subr.mxu1 %v6096_v21  ;;  %v3529_v49 = vpop.f32.mrf.mxu0  ;;  %v6101_v43 = vld [vmem:[#allocation30_spill] sm:$0xff]  ;;  %v6102_v21 = vld [vmem:[#allocation31_spill] sm:$0xff] }
 0x174   :  { %3256 = vmatpush3.msra.mxu0 %v6097_v16  ;;  %3337 = vmatpush3.msra.mxu1 %v4880_v13  ;;  %v6103_v49 = vld [vmem:[#allocation32_spill] sm:$0xff] }
 0x175   :  { %2497 = vmatprep.mubr.f32.mxu1 %v5396_v19  ;;  %3257 = vmatprep.subr.mxu0 %v6098_v18 }
 0x176   :  { %3338 = vmatprep.subr.mxu1 %v4888_v63  ;;  %3258 = vmatpush3.msra.mxu0 %v6099_v58 }
 0x177   :  { %3339 = vmatpush3.msra.mxu1 %v4895_v55  ;;  %3259 = vmatprep.subr.mxu0 %v6100_v35  ;;  %v6104_v55 = vld [vmem:[#allocation8_spill] sm:$0xff] }
 0x178   :  { %3340 = vmatprep.subr.mxu1 %v4906_v38  ;;  %3260 = vmatpush3.msra.mxu0 %v6101_v43  ;;  %v6105_v35 = vand.u32 4294901760, %v6104_v55  ;;  %v6106_v38 = vand.u32 4294901760, %v4914_v46  ;;  %v1635_v46 = vld [vmem:[%s5803_s3 + $0x138] sm:$0xff] }
 0x179   :  { %3341 = vmatpush3.msra.mxu1 %v4916_v31  ;;  %3261 = vmatprep.subr.mxu0 %v6102_v21  ;;  %v6107_v31 = vand.u32 4294901760, %v4925_v45  ;;  %v6111_v45 = vand.u32 4294901760, %v6079_v28 }
 0x17a   :  { %v5481_v13 = vpop.f32.mrf.mxu1  ;;  %3342 = vmatprep.subr.mxu1 %v4927_v17  ;;  %3262 = vmatpush3.msra.mxu0 %v6103_v49  ;;  %v6108_v17 = vand.u32 4294901760, %v4935_v34  ;;  %v1634_v34 = vld [vmem:[%s5803_s3 + $0x130] sm:$0xff] }
 0x17b   :  { %3343 = vmatpush3.msra.mxu1 %v4937_v3  ;;  %2119 = vmatmul.mubr.f32.vlgmr.msra.gmra.mxu0 %v5394_v54  ;;  %v6109_v3 = vand.u32 4294901760, %v4947_v1  ;;  %v6112_v1 = vand.u32 4294901760, %v6080_v36  ;;  %v6116_v54 = vand.u32 4294901760, %v6085_v15  ;;  %v1631_v36 = vld [vmem:[%s5803_s3 + $0x118] sm:$0xff] }
 0x17c   :  { %v3564_v63 = vpop.f32.mrf.mxu1  ;;  %3301 = vmatprep.subr.mxu0 %v6105_v35  ;;  %3344 = vmatprep.subr.mxu1 %v4949_v7  ;;  %v6110_v7 = vand.u32 4294901760, %v4958_v60  ;;  %v6113_v60 = vand.u32 4294901760, %v6082_v56  ;;  %v1632_v35 = vld [vmem:[%s5803_s3 + $0x120] sm:$0xff] }
 0x17d   :  { %3302 = vmatpush3.msra.mxu0 %v6106_v38  ;;  %2393 = vmatprep.mubr.f32.mxu0 %v5396_v19  ;;  %v5557_v56 = vand.u32 4294901760, %v1632_v35 }
 0x17e   :  { %3345 = vmatpush3.msra.mxu1 %v4960_v53  ;;  %3303 = vmatprep.subr.mxu0 %v6107_v31  ;;  %v5517_v53 = vand.u32 4294901760, %v1635_v46 }
 0x17f   :  { %3346 = vmatprep.subr.mxu1 %v4972_v23  ;;  %3304 = vmatpush3.msra.mxu0 %v6108_v17  ;;  %v1633_v23 = vld [vmem:[%s5803_s3 + $0x128] sm:$0xff]  ;;  %v5586_v55 = vsub.f32 %v1632_v35, %v5557_v56 }
 0x180   :  { %3347 = vmatpush3.msra.mxu1 %v4983_v22  ;;  %3305 = vmatprep.subr.mxu0 %v6109_v3  ;;  %v6114_v22 = vand.u32 4294901760, %v6083_v39  ;;  %v5542_v19 = vand.u32 4294901760, %v1633_v23  ;;  %v1630_v39 = vld [vmem:[%s5803_s3 + $0x110] sm:$0xff] }
 0x181   :  { %3348 = vmatprep.subr.mxu1 %v5000_v41  ;;  %3306 = vmatpush3.msra.mxu0 %v6110_v7  ;;  %v5528_v41 = vand.u32 4294901760, %v1634_v34  ;;  %v5588_v38 = vand.u32 4294901760, %v1630_v39 }
 0x182   :  { %3349 = vmatpush3.msra.mxu1 %v6078_v57  ;;  %3307 = vmatprep.subr.mxu0 %v6111_v45  ;;  %v6117_v57 = vld [vmem:[#allocation33_spill] sm:$0xff]  ;;  %v5570_v15 = vsub.f32 %v1633_v23, %v5542_v19 }
 0x183   :  { %3350 = vmatprep.subr.mxu1 %v5030_v0  ;;  %3308 = vmatpush3.msra.mxu0 %v6112_v1  ;;  %v6115_v0 = vand.u32 4294901760, %v6084_v6  ;;  %v83_v28 = vsub.s32 2, %v6117_v57  ;;  %v5620_v7 = vsub.f32 %v1630_v39, %v5588_v38 }
 0x184   :  { %3351 = vmatpush3.msra.mxu1 %v6081_v8  ;;  %3309 = vmatprep.subr.mxu0 %v6113_v60  ;;  %v5555_v8 = vsub.f32 %v1634_v34, %v5528_v41  ;;  %v2620_v31 = vand.u32 4294901760, %v5570_v15 }
 0x185   :  { %3352 = vmatprep.subr.mxu1 %v5113_v11  ;;  %3310 = vmatpush3.msra.mxu0 %v6114_v22  ;;  %v5540_v11 = vsub.f32 %v1635_v46, %v5517_v53  ;;  %v2627_v46 = vand.u32 4294901760, %v5586_v55 }
 0x186   :  { %3353 = vmatpush3.msra.mxu1 %v5127_v29  ;;  %3311 = vmatprep.subr.mxu0 %v6115_v0  ;;  %v6118_v29 = vand.u32 4294901760, %v6086_v48  ;;  %v5572_v48 = vand.u32 4294901760, %v1631_v36  ;;  %v2613_v63 = vand.u32 4294901760, %v5555_v8  ;;  %v2621_v45 = vsub.f32 %v5570_v15, %v2620_v31 }
 0x187   :  { %3354 = vmatprep.subr.mxu1 %v5141_v52  ;;  %3312 = vmatpush3.msra.mxu0 %v6116_v54  ;;  %v6119_v52 = vand.u32 4294901760, %v6087_v59  ;;  %v2606_v6 = vand.u32 4294901760, %v5540_v11  ;;  %v2628_v35 = vsub.f32 %v5586_v55, %v2627_v46  ;;  %v2641_v54 = vand.u32 4294901760, %v5620_v7 }
 0x188   :  { %3355 = vmatpush3.msra.mxu1 %v5155_v42  ;;  %3313 = vmatprep.subr.mxu0 %v6118_v29  ;;  %v6120_v42 = vand.u32 4294901760, %v6088_v9  ;;  %v6123_v9 = vand.u32 4294901760, %v6090_v20  ;;  %v1628_v20 = vld [vmem:[%s5803_s3 + $0x100] sm:$0xff]  ;;  %v2614_v3 = vsub.f32 %v5555_v8, %v2613_v63  ;;  %v6137_v29 = vand.u32 4294901760, %v6098_v18 }
 0x189   :  { %3356 = vmatprep.subr.mxu1 %v5170_v61  ;;  %3314 = vmatpush3.msra.mxu0 %v6119_v52  ;;  %v6121_v61 = vand.u32 4294901760, %v6089_v50  ;;  %v6124_v50 = vand.u32 4294901760, %v6091_v40  ;;  %v2607_v40 = vsub.f32 %v5540_v11, %v2606_v6  ;;  %v2622_v52 = vand.u32 4294901760, %v2621_v45 }
 0x18a   :  { %3357 = vmatpush3.msra.mxu1 %v5185_v12  ;;  %3315 = vmatprep.subr.mxu0 %v6120_v42  ;;  %v6122_v12 = vld [vmem:[#allocation34_spill] sm:$0xff]  ;;  %v2615_v0 = vand.u32 4294901760, %v2614_v3  ;;  %v6142_v18 = vand.u32 4294901760, %v6101_v43 }
 0x18b   :  { %3358 = vmatprep.subr.mxu1 %v5200_v14  ;;  %3316 = vmatpush3.msra.mxu0 %v6121_v61  ;;  %v84_v59 = vrot.slane %v6122_v12, %v83_v28  ;;  %v1629_v14 = vld [vmem:[%s5803_s3 + $0x108] sm:$0xff]  ;;  %v6140_v12 = vld [vmem:[#allocation29_spill] sm:$0xff] }
 0x18c   :  { %3359 = vmatpush3.msra.mxu1 %v5215_v10  ;;  %3317 = vmatprep.subr.mxu0 %v6123_v9  ;;  %v6125_v10 = vand.u32 4294901760, %v6092_v2  ;;  %v5606_v2 = vand.u32 4294901760, %v1629_v14  ;;  %v2642_v9 = vsub.f32 %v5620_v7, %v2641_v54 }
 0x18d   :  { %3360 = vmatprep.subr.mxu1 %v5226_v47  ;;  %3318 = vmatpush3.msra.mxu0 %v6124_v50  ;;  %v6126_v47 = vand.u32 4294901760, %v6093_v33  ;;  %v1031_v17 = vadd.f32 %v5398_v4, %v84_v59  ;;  %v6128_v33 = vand.u32 4294901760, %v5235_v37  ;;  %v5622_v4 = vand.u32 4294901760, %v1628_v20 }
 0x18e   :  { %3361 = vmatpush3.msra.mxu1 %v5237_v26  ;;  %3319 = vmatprep.subr.mxu0 %v6125_v10  ;;  %v5604_v26 = vsub.f32 %v1631_v36, %v5572_v48  ;;  %v6130_v37 = vand.u32 4294901760, %v6095_v5  ;;  %v5635_v1 = vsub.f32 %v1629_v14, %v5606_v2  ;;  %v6135_v5 = vand.u32 4294901760, %v6097_v16 }
 0x18f   :  { %3362 = vmatprep.subr.mxu1 %v5248_v44  ;;  %3320 = vmatpush3.msra.mxu0 %v6126_v47  ;;  %v6127_v44 = vand.u32 4294901760, %v5224_v27  ;;  %v6129_v27 = vand.u32 4294901760, %v5246_v30  ;;  %v6132_v30 = vld [vmem:[#allocation18_spill] sm:$0xff]  ;;  %v5649_v57 = vsub.f32 %v1628_v20, %v5622_v4  ;;  %v6138_v36 = vmov 0.0  }
 0x190   :  { %3363 = vmatpush3.msra.mxu1 %v5259_v32  ;;  %v2634_v34 = vand.u32 4294901760, %v5604_v26  ;;  %v6133_v23 = vand.u32 4294901760, %v6132_v30  ;;  %v6139_v16 = vand.u32 4294901760, %v6099_v58  ;;  %v2648_v39 = vand.u32 4294901760, %v5635_v1 }
 0x191   :  { %3321 = vmatprep.subr.mxu0 %v6127_v44  ;;  %3364 = vmatprep.subr.mxu1 %v5272_v51  ;;  %v2608_v51 = vand.u32 4294901760, %v2607_v40  ;;  %v6141_v59 = vand.u32 4294901760, %v6140_v12  ;;  %v2629_v58 = vand.u32 4294901760, %v2628_v35  ;;  %v2655_v14 = vand.u32 4294901760, %v5649_v57 }
 0x192   :  { %3322 = vmatpush3.msra.mxu0 %v6128_v33  ;;  %3365 = vmatpush3.msra.mxu1 %v5285_v24  ;;  %v6131_v24 = vld [vmem:[#allocation36_spill] sm:$0xff]  ;;  %v2635_v42 = vsub.f32 %v5604_v26, %v2634_v34  ;;  %v6143_v10 = vand.u32 4294901760, %v6102_v21  ;;  %v6144_v20 = vand.u32 4294901760, %v6103_v49  ;;  %v2649_v47 = vsub.f32 %v5635_v1, %v2648_v39 }
 0x193   :  { %3323 = vmatprep.subr.mxu0 %v6129_v27  ;;  %v1493_v32 = vpop.f32.mrf.mxu0  ;;  %3366 = vmatprep.subr.mxu1 %v5295_v62  ;;  %v1182_v60 = vadd.f32 %v6131_v24, %v1031_v17  ;;  %v6134_v62 = vld [vmem:[#allocation35_spill] sm:$0xff]  ;;  %v2643_v21 = vand.u32 4294901760, %v2642_v9  ;;  %v2656_v49 = vsub.f32 %v5649_v57, %v2655_v14 }
 0x194   :  { %3324 = vmatpush3.msra.mxu0 %v6130_v37  ;;  %3367 = vmatpush3.msra.mxu1 %v5305_v25  ;;  %v6136_v25 = vld [vmem:[#allocation13_spill] sm:$0xff]  ;;  %v2636_v43 = vand.u32 4294901760, %v2635_v42  ;;  %v2650_v33 = vand.u32 4294901760, %v2649_v47 }
 0x195   :  { %3325 = vmatprep.subr.mxu0 %v6133_v23  ;;  %2499 = vmatmul.mubr.f32.vlgmr.msra.gmra.mxu1 %v6134_v62  ;;  %v3599_v22 = vpop.f32.mrf.mxu0  ;;  %v1286_v28 = vadd.f32 %v6136_v25, %v1182_v60  ;;  %v2657_v3 = vand.u32 4294901760, %v2656_v49 }
 0x196   :  { %3326 = vmatpush3.msra.mxu0 %v6135_v5  ;;  %3654 = vmatprep.subr.mxu1 %v6138_v36 }
 0x197   :  { %3327 = vmatprep.subr.mxu0 %v6137_v29  ;;  %3655 = vmatpush3.msra.mxu1 %v2608_v51  ;;  %v1375_v61 = vadd.f32 %v5481_v13, %v1286_v28 }
 0x198   :  { %3328 = vmatpush3.msra.mxu0 %v6139_v16  ;;  %3656 = vmatprep.subr.mxu1 %v6138_v36 }
 0x199   :  { %3329 = vmatprep.subr.mxu0 %v6141_v59  ;;  %3657 = vmatpush3.msra.mxu1 %v2615_v0  ;;  %v1494_v50 = vadd.f32 %v1493_v32, %v1375_v61 }
 0x19a   :  { %3330 = vmatpush3.msra.mxu0 %v6142_v18  ;;  %3658 = vmatprep.subr.mxu1 %v6138_v36 }
 0x19b   :  { %3331 = vmatprep.subr.mxu0 %v6143_v10  ;;  %v1580_v13 = vpop.f32.mrf.mxu1  ;;  %3659 = vmatpush3.msra.mxu1 %v2622_v52 }
 0x19c   :  { %3332 = vmatpush3.msra.mxu0 %v6144_v20  ;;  %v1581_v40 = vadd.f32 %v1580_v13, %v1494_v50  ;;  %3660 = vmatprep.subr.mxu1 %v6138_v36 }
 0x19d   :  { %2395 = vmatmul.mubr.f32.vlgmr.msra.gmra.mxu0 %v6134_v62  ;;  %v3634_v17 = vpop.f32.mrf.mxu1  ;;  %3661 = vmatpush3.msra.mxu1 %v2629_v58 }
 0x19e   :  { %3635 = vmatprep.subr.mxu0 %v6138_v36  ;;  %v1586_v44 = vmul.f32 0.5, %v1581_v40  ;;  %3662 = vmatprep.subr.mxu1 %v6138_v36 }
 0x19f   :  { %3636 = vmatpush3.msra.mxu0 %v5517_v53  ;;  %3663 = vmatpush3.msra.mxu1 %v2636_v43 }
 0x1a0   :  { %3637 = vmatprep.subr.mxu0 %v6138_v36  ;;  %3758 = vtanh.f32 %v1586_v44  ;;  %3664 = vmatprep.subr.mxu1 %v6138_v36 }
 0x1a1   :  { %3638 = vmatpush3.msra.mxu0 %v5528_v41  ;;  %3665 = vmatpush3.msra.mxu1 %v2643_v21 }
 0x1a2   :  { %3639 = vmatprep.subr.mxu0 %v6138_v36  ;;  %3666 = vmatprep.subr.mxu1 %v6138_v36 }
 0x1a3   :  { %3640 = vmatpush3.msra.mxu0 %v5542_v19  ;;  %3667 = vmatpush3.msra.mxu1 %v2650_v33 }
 0x1a4   :  { %3641 = vmatprep.subr.mxu0 %v6138_v36  ;;  %3668 = vmatprep.subr.mxu1 %v6138_v36 }
 0x1a5   :  { %3642 = vmatpush3.msra.mxu0 %v5557_v56  ;;  %3669 = vmatpush3.msra.mxu1 %v2657_v3 }
 0x1a6   :  { %3643 = vmatprep.subr.mxu0 %v6138_v36  ;;  %3670 = vmatprep.mubr.msk.f32.mxu1 %vm3783_vm0, %v6138_v36 }
 0x1a7   :  { %3692 = vmatprep.subr.mxu1 %v6138_v36  ;;  %3644 = vmatpush3.msra.mxu0 %v5572_v48 }
 0x1a8   :  { %3651 = vmatprep.mubr.msk.f32.mxu0 %vm3783_vm0, %v6138_v36  ;;  %3645 = vmatprep.subr.mxu0 %v6138_v36 }
 0x1a9   :  { %3646 = vmatpush3.msra.mxu0 %v5588_v38 }
 0x1aa   :  { %3647 = vmatprep.subr.mxu0 %v6138_v36 }
 0x1ab   :  { %3648 = vmatpush3.msra.mxu0 %v5606_v2 }
 0x1ac   :  { %3649 = vmatprep.subr.mxu0 %v6138_v36 }
 0x1ad   :  { %v3759_v27 = vpop.eup %3758  ;;  %3650 = vmatpush3.msra.mxu0 %v5622_v4 }
 0x1ae   :  { %v1592_v32 = vmul.f32 0.5, %v3759_v27  ;;  %3673 = vmatprep.subr.mxu0 %v6138_v36 }
 0x1b0   :  { %v1595_v37 = vadd.f32 0.5, %v1592_v32 }
 0x1b2   :  { %v1640_v51 = vsel %vm1638_vm1, %v1595_v37, 0 }
 0x1b3   :  { %v5710_v45 = vand.u32 4294901760, %v1640_v51 }
 0x1b5   :  { %3671 = vmatmul.mubr.f32.vlgmr.msra.gmra.mxu1 %v5710_v45  ;;  %v2578_v24 = vsub.f32 %v1640_v51, %v5710_v45 }
 0x1b6   :  { %3693 = vmatpush3.msra.mxu1 %v5517_v53  ;;  %3708 = vmatprep.mubr.msk.f32.mxu1 %vm3783_vm0, %v6138_v36 }
 0x1b7   :  { %3694 = vmatprep.subr.mxu1 %v6138_v36  ;;  %v2579_v60 = vand.u32 4294901760, %v2578_v24 }
 0x1b8   :  { %3695 = vmatpush3.msra.mxu1 %v5528_v41 }
 0x1b9   :  { %3696 = vmatprep.subr.mxu1 %v6138_v36  ;;  %v2580_v30 = vsub.f32 %v2578_v24, %v2579_v60 }
 0x1ba   :  { %3697 = vmatpush3.msra.mxu1 %v5542_v19 }
 0x1bb   :  { %3698 = vmatprep.subr.mxu1 %v6138_v36  ;;  %v2581_v23 = vand.u32 4294901760, %v2580_v30 }
 0x1bc   :  { %3699 = vmatpush3.msra.mxu1 %v5557_v56 }
 0x1bd   :  { %3700 = vmatprep.subr.mxu1 %v6138_v36  ;;  %3652 = vmatmul.mubr.f32.vlgmr.msra.gmra.mxu0 %v2581_v23 }
 0x1be   :  { %3674 = vmatpush3.msra.mxu0 %v5540_v11  ;;  %3701 = vmatpush3.msra.mxu1 %v5572_v48 }
 0x1bf   :  { %3675 = vmatprep.subr.mxu0 %v6138_v36  ;;  %3702 = vmatprep.subr.mxu1 %v6138_v36 }
 0x1c0   :  { %3676 = vmatpush3.msra.mxu0 %v5555_v8  ;;  %3703 = vmatpush3.msra.mxu1 %v5588_v38 }
 0x1c1   :  { %3677 = vmatprep.subr.mxu0 %v6138_v36  ;;  %3704 = vmatprep.subr.mxu1 %v6138_v36 }
 0x1c2   :  { %3678 = vmatpush3.msra.mxu0 %v5570_v15  ;;  %3705 = vmatpush3.msra.mxu1 %v5606_v2 }
 0x1c3   :  { %3679 = vmatprep.subr.mxu0 %v6138_v36  ;;  %3706 = vmatprep.subr.mxu1 %v6138_v36 }
 0x1c4   :  { %3680 = vmatpush3.msra.mxu0 %v5586_v55  ;;  %3707 = vmatpush3.msra.mxu1 %v5622_v4 }
 0x1c5   :  { %3681 = vmatprep.subr.mxu0 %v6138_v36  ;;  %3709 = vmatmul.mubr.f32.vlgmr.msra.gmra.mxu1 %v2579_v60 }
 0x1c6   :  { %3730 = vmatprep.subr.mxu1 %v6138_v36  ;;  %3682 = vmatpush3.msra.mxu0 %v5604_v26 }
 0x1c7   :  { %3731 = vmatpush3.msra.mxu1 %v5517_v53  ;;  %3683 = vmatprep.subr.mxu0 %v6138_v36 }
 0x1c8   :  { %3732 = vmatprep.subr.mxu1 %v6138_v36  ;;  %3684 = vmatpush3.msra.mxu0 %v5620_v7  ;;  %v1637_v7 = vstv %s5804_s4 }
 0x1c9   :  { %3733 = vmatpush3.msra.mxu1 %v5528_v41  ;;  %3685 = vmatprep.subr.mxu0 %v6138_v36 }
 0x1ca   :  { %3734 = vmatprep.subr.mxu1 %v6138_v36  ;;  %3686 = vmatpush3.msra.mxu0 %v5635_v1 }
 0x1cb   :  { %3735 = vmatpush3.msra.mxu1 %v5542_v19  ;;  %3687 = vmatprep.subr.mxu0 %v6138_v36 }
 0x1cc   :  { %3736 = vmatprep.subr.mxu1 %v6138_v36  ;;  %3688 = vmatpush3.msra.mxu0 %v5649_v57 }
 0x1cd   :  { %3689 = vmatprep.mubr.msk.f32.mxu0 %vm3783_vm0, %v6138_v36  ;;  %3737 = vmatpush3.msra.mxu1 %v5557_v56 }
 0x1ce   :  { %3690 = vmatmul.mubr.f32.vlgmr.msra.gmra.mxu0 %v2578_v24  ;;  %3711 = vmatprep.subr.mxu0 %v6138_v36 }
 0x1cf   :  { %3738 = vmatprep.subr.mxu1 %v6138_v36  ;;  %3712 = vmatpush3.msra.mxu0 %v2606_v6 }
 0x1d0   :  { %3739 = vmatpush3.msra.mxu1 %v5572_v48  ;;  %3713 = vmatprep.subr.mxu0 %v6138_v36 }
 0x1d1   :  { %3740 = vmatprep.subr.mxu1 %v6138_v36  ;;  %3714 = vmatpush3.msra.mxu0 %v2613_v63 }
 0x1d2   :  { %3741 = vmatpush3.msra.mxu1 %v5588_v38  ;;  %3715 = vmatprep.subr.mxu0 %v6138_v36 }
 0x1d3   :  { %3742 = vmatprep.subr.mxu1 %v6138_v36  ;;  %3716 = vmatpush3.msra.mxu0 %v2620_v31 }
 0x1d4   :  { %3743 = vmatpush3.msra.mxu1 %v5606_v2  ;;  %3717 = vmatprep.subr.mxu0 %v6138_v36 }
 0x1d5   :  { %3744 = vmatprep.subr.mxu1 %v6138_v36  ;;  %3718 = vmatpush3.msra.mxu0 %v2627_v46 }
 0x1d6   :  { %3745 = vmatpush3.msra.mxu1 %v5622_v4  ;;  %3746 = vmatprep.mubr.msk.f32.mxu1 %vm3783_vm0, %v6138_v36 }
 0x1d7   :  { %3719 = vmatprep.subr.mxu0 %v6138_v36  ;;  %3747 = vmatmul.mubr.f32.vlgmr.msra.gmra.mxu1 %v5710_v45 }
 0x1d8   :  { %3720 = vmatpush3.msra.mxu0 %v2634_v34  ;;  %3727 = vmatprep.mubr.msk.f32.mxu0 %vm3783_vm0, %v6138_v36 }
 0x1d9   :  { %3721 = vmatprep.subr.mxu0 %v6138_v36 }
 0x1da   :  { %3722 = vmatpush3.msra.mxu0 %v2641_v54 }
 0x1db   :  { %3723 = vmatprep.subr.mxu0 %v6138_v36 }
 0x1dc   :  { %3724 = vmatpush3.msra.mxu0 %v2648_v39 }
 0x1dd   :  { %3725 = vmatprep.subr.mxu0 %v6138_v36 }
 0x1de   :  { %3726 = vmatpush3.msra.mxu0 %v2655_v14 }
 0x1df   :  { %3728 = vmatmul.mubr.f32.vlgmr.msra.gmra.mxu0 %v5710_v45 }
 0x212   :  { %v3228_v53 = vpop.f32.mrf.mxu1 }
 0x214   :  { %v3229_v41 = vpop.f32.mrf.mxu1 }
 0x215   :  { %v3230_v1 = vadd.f32 %v3229_v41, %v3228_v53 }
 0x21a   :  { %v3193_v19 = vpop.f32.mrf.mxu0 }
 0x21c   :  { %v3194_v56 = vpop.f32.mrf.mxu0 }
 0x21d   :  { %v3195_v46 = vadd.f32 %v3194_v56, %v3193_v19 }
 0x21f   :  { %v1751_v34 = vadd.f32 %v3195_v46, %v1637_v7 }
 0x221   :  { %v1983_v22 = vadd.f32 %v3230_v1, %v1751_v34 }
 0x233   :  { %v3298_v11 = vpop.f32.mrf.mxu1 }
 0x235   :  { %v3299_v8 = vpop.f32.mrf.mxu1 }
 0x236   :  { %v3300_v54 = vadd.f32 %v3299_v8, %v3298_v11 }
 0x23b   :  { %v3263_v15 = vpop.f32.mrf.mxu0 }
 0x23d   :  { %v3264_v63 = vpop.f32.mrf.mxu0 }
 0x23e   :  { %v3265_v62 = vadd.f32 %v3264_v63, %v3263_v15 }
 0x240   :  { %v2121_v35 = vadd.f32 %v3265_v62, %v1983_v22 }
 0x242   :  { %v2229_v25 = vadd.f32 %v3300_v54, %v2121_v35 }
 0x255   :  { %v3368_v6 = vpop.f32.mrf.mxu1 }
 0x257   :  { %v3369_v48 = vpop.f32.mrf.mxu1 }
 0x258   :  { %v3370_v36 = vadd.f32 %v3369_v48, %v3368_v6 }
 0x25d   :  { %v3333_v38 = vpop.f32.mrf.mxu0 }
 0x25f   :  { %v3334_v26 = vpop.f32.mrf.mxu0 }
 0x260   :  { %v3335_v57 = vadd.f32 %v3334_v26, %v3333_v38 }
 0x262   :  { %v2397_v28 = vadd.f32 %v3335_v57, %v2229_v25 }
 0x264   :  { %v2501_v52 = vadd.f32 %v3370_v36, %v2397_v28 }
 0x275   :  { %v2694_v55 = vpop.f32.mrf.mxu1 }
 0x277   :  { %v3672_v31 = vpop.f32.mrf.mxu1 }
 0x27d   :  { %v2583_v2 = vpop.f32.mrf.mxu0 }
 0x27e   :  { %v2584_v42 = vadd.f32 %v2583_v2, %v2501_v52 }
 0x27f   :  { %v3653_v4 = vpop.f32.mrf.mxu0 }
 0x280   :  { %v2695_v61 = vadd.f32 %v2694_v55, %v2584_v42 }
 0x285   :  { %v2863_v5 = vpop.f32.mrf.mxu1 }
 0x287   :  { %v3710_v0 = vpop.f32.mrf.mxu1 }
 0x28e   :  { %v2782_v29 = vpop.f32.mrf.mxu0 }
 0x28f   :  { %v2783_v59 = vadd.f32 %v2782_v29, %v2695_v61 }
 0x290   :  { %v3691_v16 = vpop.f32.mrf.mxu0 }
 0x291   :  { %v2864_v18 = vadd.f32 %v2863_v5, %v2783_v59 }
 0x297   :  { %v3037_v39 = vpop.f32.mrf.mxu1 }
 0x299   :  { %v3748_v12 = vpop.f32.mrf.mxu1 }
 0x29f   :  { %v2958_v58 = vpop.f32.mrf.mxu0 }
 0x2a0   :  { %v2959_v9 = vadd.f32 %v2958_v58, %v2864_v18 }
 0x2a1   :  { %v3729_v14 = vpop.f32.mrf.mxu0 }
 0x2a2   :  { %v3038_v50 = vadd.f32 %v3037_v39, %v2959_v9 }
 0x2a4   :  { %3042 = vst.msk [vmem:[#allocation3] sm:$0xff] %vm3041_vm2, %v3038_v50 }
 0x2a5   :  { %3047 = vsyncadd [#allocation4], 112  ;;  %s3784_s4 = smov [#allocation3]  }
 0x2a6   :  { %s3048_s14 = sshll.u32 %s3784_s4, 4  ;;  %s3049_s14 = int_to_ptr.vmem [resolvable:$true] %s3048_s14 }
 0x2a7   :  { %s3760_s15 = scalar_lea.vmem %s3049_s14, 16  ;;  %s3764_s16 = scalar_lea.vmem %s3049_s14, 128 }
 0x2a8   :  { %p3761_p0 = scmp.ne.s32.totalorder %s3049_s14, %s3760_s15  ;;  %p3765_p1 = scmp.lt.s32.totalorder %s3049_s14, %s3049_s14 }
 0x2a9   :  { %p3766_p2 = scmp.lt.s32.totalorder %s3764_s16, %s3760_s15 }
 0x2ab   :  { %p3767_p3 = por %p3766_p2, %p3765_p1 }
 0x2ad   :  { %p3768_p4 = pnand %p3767_p3, %p3761_p0 }
 0x2af   :  { %3771 = shalt.err (!%p3768_p4)
}
 0x2b0   :  { %s3785_s17 = smov 16   ;;  %s3786_s18 = smov 1  }
 0x2b1   :  { %3054 = dma.vmem_to_hbm [thread:$0]  %s3049_s14, 16, %s5805_s5, [#allocation4], %s3785_s17, %s3785_s17, %s3786_s18  }
 0x2b2   :  { %3780 = dma.done.wait [#allocation4], 128  }
 0x2b3   :  { %3781 = vsyncadd [#allocation4], 4294967168 }
 0x2b4   :  { %3058 = vsyncpa [#allocation4], 1 }

</bundles_post_ra>
